<compile_context>
chip_gen: v6e
topology: v6e:2x2x1
jax: 0.10.0
libtpu: 0.0.40
codegen_flags: <defaults>
</compile_context>

<pallas_src>
import math
import functools

import jax
import jax.numpy as jnp
from jax.experimental import pallas as pl
from jax.experimental.pallas import tpu as pltpu


def _context_emb_kernel(ids_ref, table_ref, pvec_ref, pe_ref, out_ref,
                        *, spe1_idx, spe2_idx, scale, tile_n, blocks_per_seq):
    ids = ids_ref[...]                      # [TN, 2] int32 (col 0: context, col 1: segs)
    ctx = ids[:, 0:1]                       # [TN, 1]
    segs = ids[:, 1:2]                      # [TN, 1]

    table = table_ref[...]                  # [V, E] bf16
    tn = ids.shape[0]
    vocab = table.shape[0]

    # ---- embedding lookup: one-hot @ table on the MXU, * sqrt(E) -----------
    # TODO(synk): for large vocab replace with an HBM row-gather via
    # scalar-prefetch + make_async_copy (see header note).
    v_iota = jax.lax.broadcasted_iota(jnp.int32, (tn, vocab), 1)
    ctx_oh = (v_iota == ctx).astype(jnp.bfloat16)                  # [TN, V]
    emb = jnp.dot(ctx_oh, table,
                  preferred_element_type=jnp.float32) * scale      # [TN, E] f32

    # ---- speaker-conditional persona add (persona sums precomputed) --------
    # Additive masked form: identical to the two sequential torch.where adds
    # (spe1_idx != spe2_idx so the masks are mutually exclusive), but avoids
    # two full-tile selects on the VPU.
    pvec = pvec_ref[...]                    # [2, E] f32
    m1 = (segs == spe1_idx).astype(jnp.float32)                    # [TN, 1]
    m2 = (segs == spe2_idx).astype(jnp.float32)                    # [TN, 1]
    emb = emb + m1 * pvec[0:1, :] + m2 * pvec[1:2, :]

    # ---- positional encoding add (PE block is grid-invariant / resident) ---
    if blocks_per_seq == 1:
        pe_blk = pe_ref[...]                                       # [TN, E] bf16
    else:
        start = pl.multiple_of(
            (pl.program_id(0) % blocks_per_seq) * tile_n, tile_n)
        pe_blk = pe_ref[pl.ds(start, tile_n), :]
    emb = emb + pe_blk.astype(jnp.float32)

    # TODO(synk): nn.Dropout is identity in eval mode; omitted here.
    out_ref[...] = emb.astype(out_ref.dtype)


def _choose_tile(seq_len, requested):
    """Largest tile <= requested that divides seq_len and is a multiple of 16."""
    cands = [t for t in range(16, min(requested, seq_len) + 1, 16)
             if seq_len % t == 0]
    if not cands:
        raise ValueError(
            f"seq_len={seq_len} has no tile size that is a multiple of 16; "
            "pad the sequence length.")
    return max(cands)


def _vmem_cap_bytes():
    """Generation-aware VMEM budget with ~25% headroom."""
    try:
        cap = int(pltpu.get_tpu_info().vmem_capacity_bytes)
    except Exception:
        cap = 64 * 1024 * 1024   # conservative fallback (v7x per-TC size)
    return int(cap * 0.75)


def context_emb_forward(context, segs, personas_no_tag, tags, table, pe,
                        *, spe1_idx, spe2_idx, tile_n=1024,
                        out_dtype=jnp.float32):
    B, S = context.shape
    V, E = table.shape
    N = B * S
    tile_n = _choose_tile(S, tile_n)        # tile_n | S  =>  tile_n | N
    blocks_per_seq = S // tile_n
    scale = float(math.sqrt(E))

    # --- grid-invariant work hoisted out of the kernel -----------------------
    # persona vector per speaker: sum of emb(cat(personas_no_tag, tags), dim=1)
    persona_ids = jnp.concatenate([personas_no_tag, tags], axis=1)        # [2, P+T]
    persona_vec = table[persona_ids].sum(axis=1).astype(jnp.float32)      # [2, E]

    # --- glue: merge id streams; cast weight / PE streams to bf16 ------------
    ids = jnp.stack([context.reshape(N), segs.reshape(N)],
                    axis=1).astype(jnp.int32)                             # [N, 2]
    table_bf = table.astype(jnp.bfloat16)                                 # [V, E]
    pe_seq = pe[:S].astype(jnp.bfloat16)                                  # [S, E]

    kernel = functools.partial(_context_emb_kernel,
                               spe1_idx=int(spe1_idx), spe2_idx=int(spe2_idx),
                               scale=scale, tile_n=tile_n,
                               blocks_per_seq=blocks_per_seq)

    out_bytes = jnp.dtype(out_dtype).itemsize
    # constant blocks single-buffered, streamed blocks double-buffered
    vmem_est = (
        2 * tile_n * 2 * 4                 # ids stream (int32, 2 buffers)
        + V * E * 2                        # table (bf16, 1 buffer)
        + 2 * E * 4                        # persona vecs (f32, 1 buffer)
        + S * E * 2                        # PE (bf16, 1 buffer)
        + 2 * tile_n * E * out_bytes       # output stream (2 buffers)
        + tile_n * V * (4 + 2)             # int32 iota + bf16 one-hot temps
        + 3 * tile_n * E * 4               # f32 emb / masked-add temps
    )
    vmem_limit = int(min(_vmem_cap_bytes(),
                         max(2 * vmem_est, 16 * 1024 * 1024)))

    const1 = pl.Buffered(1)                # constants: DMA once, single buffer

    out = pl.pallas_call(
        kernel,
        out_shape=jax.ShapeDtypeStruct((N, E), out_dtype),
        grid_spec=pltpu.PrefetchScalarGridSpec(
            num_scalar_prefetch=0,
            grid=(N // tile_n,),
            in_specs=[
                pl.BlockSpec((tile_n, 2), lambda i: (i, 0)),              # ids (ctx, segs)
                pl.BlockSpec((V, E), lambda i: (0, 0),
                             pipeline_mode=const1),                       # table (constant)
                pl.BlockSpec((2, E), lambda i: (0, 0),
                             pipeline_mode=const1),                       # persona vecs (constant)
                pl.BlockSpec((S, E), lambda i: (0, 0),
                             pipeline_mode=const1),                       # PE, resident [S, E]
            ],
            out_specs=pl.BlockSpec((tile_n, E), lambda i: (i, 0)),
        ),
        compiler_params=pltpu.CompilerParams(
            dimension_semantics=("parallel",),
            vmem_limit_bytes=vmem_limit),
    )(ids, table_bf, persona_vec, pe_seq)

    return out.reshape(B, S, E)


def sinusoidal_pe(max_len, d_model):
    # PositionalEncoding buffer (computed in __init__ in the PyTorch module).
    position = jnp.arange(max_len, dtype=jnp.float32)[:, None]
    div_term = jnp.exp(jnp.arange(0, d_model, 2, dtype=jnp.float32)
                       * (-math.log(10000.0) / d_model))
    ang = position * div_term[None, :]
    pe = jnp.zeros((max_len, d_model), jnp.float32)
    pe = pe.at[:, 0::2].set(jnp.sin(ang))
    pe = pe.at[:, 1::2].set(jnp.cos(ang))
    return pe


if __name__ == "__main__":
    B, S, V, E = 4, 512, 64, 128        # batch, seq, vocab (input_dim), emb_dim
    P, T = 8, 8                         # persona tokens, tag tokens per speaker
    pad_idx, sep_idx, spe1_idx, spe2_idx = 0, 1, 2, 3

    key = jax.random.PRNGKey(0)
    k_emb, k_ctx, k_seg, k_per, k_tag = jax.random.split(key, 5)

    # deterministic synthetic embedding table, pad row zeroed (padding_idx).
    table = jax.random.normal(k_emb, (V, E), jnp.float32)
    table = table.at[pad_idx].set(0.0)

    context = jax.random.randint(k_ctx, (B, S), 4, V, dtype=jnp.int32)
    segs = jnp.where(jax.random.bernoulli(k_seg, 0.5, (B, S)),
                     spe1_idx, spe2_idx).astype(jnp.int32)
    personas_no_tag = jax.random.randint(k_per, (2, P), 4, V, dtype=jnp.int32)
    tags = jax.random.randint(k_tag, (2, T), 4, V, dtype=jnp.int32)

    pe = sinusoidal_pe(1024, E)

    out = context_emb_forward(context, segs, personas_no_tag, tags, table, pe,
                              spe1_idx=spe1_idx, spe2_idx=spe2_idx)
    out = jax.block_until_ready(out)
    assert out.shape == (B, S, E)

    # pure-JAX reference mirroring the PyTorch forward exactly (dropout = eval).
    scale = math.sqrt(E)
    pvec = jnp.concatenate([table[personas_no_tag], table[tags]], axis=1).sum(axis=1)

    def reference(tab, pe_buf):
        emb = tab[context] * scale
        emb = jnp.where((segs == spe1_idx)[..., None], emb + pvec[0], emb)
        emb = jnp.where((segs == spe2_idx)[..., None], emb + pvec[1], emb)
        return emb + pe_buf[:S][None]

    # tight check against the bf16-rounded streams the kernel actually consumes
    table_q = table.astype(jnp.bfloat16).astype(jnp.float32)
    pe_q = pe.astype(jnp.bfloat16).astype(jnp.float32)
    assert jnp.allclose(out, reference(table_q, pe_q), atol=1e-5, rtol=1e-5)

    # looser sanity check against the full-f32 PyTorch-equivalent forward
    assert jnp.allclose(out, reference(table, pe), atol=2e-1, rtol=2e-2)

    print("KERNEL_OK")
</pallas_src>

<mosaic_0001>
module attributes {stable_mosaic.version = 11 : i64} {
  func.func @_context_emb_kernel(%arg0: i32, %arg1: memref<512x2xi32, #tpu.memory_space<vmem>>, %arg2: memref<64x128xbf16, #tpu.memory_space<vmem>>, %arg3: memref<2x128xf32, #tpu.memory_space<vmem>>, %arg4: memref<512x128xbf16, #tpu.memory_space<vmem>>, %arg5: memref<512x128xf32, #tpu.memory_space<vmem>>) attributes {dimension_semantics = [#tpu.dimension_semantics<parallel>], iteration_bounds = array<i64: 4>, scalar_prefetch = 0 : i64, scratch_operands = 0 : i64, tpu.core_type = #tpu.core_type<tc>, window_params = [{transform_indices = @transform_0, window_bounds = array<i64: 512, 2>}, {pipeline_mode = #tpu.pipeline_mode<synchronous>, transform_indices = @transform_1, window_bounds = array<i64: 64, 128>}, {pipeline_mode = #tpu.pipeline_mode<synchronous>, transform_indices = @transform_2, window_bounds = array<i64: 2, 128>}, {pipeline_mode = #tpu.pipeline_mode<synchronous>, transform_indices = @transform_3, window_bounds = array<i64: 512, 128>}, {transform_indices = @transform_4, window_bounds = array<i64: 512, 128>}]} {
    %c0 = arith.constant 0 : index
    %c0_0 = arith.constant 0 : index
    %0 = vector.load %arg1[%c0, %c0_0] : memref<512x2xi32, #tpu.memory_space<vmem>>, vector<512x2xi32>
    %1 = vector.extract_strided_slice %0 {offsets = [0, 0], sizes = [512, 1], strides = [1, 1]} : vector<512x2xi32> to vector<512x1xi32>
    %2 = vector.extract_strided_slice %0 {offsets = [0, 1], sizes = [512, 1], strides = [1, 1]} : vector<512x2xi32> to vector<512x1xi32>
    %c0_1 = arith.constant 0 : index
    %c0_2 = arith.constant 0 : index
    %3 = vector.load %arg2[%c0_1, %c0_2] : memref<64x128xbf16, #tpu.memory_space<vmem>>, vector<64x128xbf16>
    %4 = tpu.iota {dimensions = array<i32: 1>} : vector<512x64xi32>
    %5 = vector.broadcast %1 : vector<512x1xi32> to vector<512x64xi32>
    %6 = arith.cmpi eq, %4, %5 : vector<512x64xi32>
    %7 = arith.extui %6 : vector<512x64xi1> to vector<512x64xi32>
    %8 = arith.sitofp %7 : vector<512x64xi32> to vector<512x64xf32>
    %9 = arith.truncf %8 : vector<512x64xf32> to vector<512x64xbf16>
    %cst = arith.constant dense<0.000000e+00> : vector<512x128xf32>
    %10 = tpu.matmul %9, %3, %cst {dimension_numbers = #tpu.dot_dimension_numbers<[1], [0], [0], [1], [0, 0, 1, 1], [], []>} : vector<512x64xbf16>, vector<64x128xbf16>, vector<512x128xf32> -> vector<512x128xf32>
    %cst_3 = arith.constant 11.3137083 : f32
    %11 = vector.broadcast %cst_3 : f32 to vector<512x128xf32>
    %12 = arith.mulf %10, %11 : vector<512x128xf32>
    %c0_4 = arith.constant 0 : index
    %c0_5 = arith.constant 0 : index
    %13 = vector.load %arg3[%c0_4, %c0_5] : memref<2x128xf32, #tpu.memory_space<vmem>>, vector<2x128xf32>
    %c2_i32 = arith.constant 2 : i32
    %14 = vector.broadcast %c2_i32 : i32 to vector<512x1xi32>
    %15 = arith.cmpi eq, %2, %14 : vector<512x1xi32>
    %16 = arith.extui %15 : vector<512x1xi1> to vector<512x1xi32>
    %17 = arith.sitofp %16 : vector<512x1xi32> to vector<512x1xf32>
    %c3_i32 = arith.constant 3 : i32
    %18 = vector.broadcast %c3_i32 : i32 to vector<512x1xi32>
    %19 = arith.cmpi eq, %2, %18 : vector<512x1xi32>
    %20 = arith.extui %19 : vector<512x1xi1> to vector<512x1xi32>
    %21 = arith.sitofp %20 : vector<512x1xi32> to vector<512x1xf32>
    %22 = vector.extract_strided_slice %13 {offsets = [0, 0], sizes = [1, 128], strides = [1, 1]} : vector<2x128xf32> to vector<1x128xf32>
    %23 = vector.broadcast %17 : vector<512x1xf32> to vector<512x128xf32>
    %24 = vector.broadcast %22 : vector<1x128xf32> to vector<512x128xf32>
    %25 = arith.mulf %23, %24 : vector<512x128xf32>
    %26 = arith.addf %12, %25 : vector<512x128xf32>
    %27 = vector.extract_strided_slice %13 {offsets = [1, 0], sizes = [1, 128], strides = [1, 1]} : vector<2x128xf32> to vector<1x128xf32>
    %28 = vector.broadcast %21 : vector<512x1xf32> to vector<512x128xf32>
    %29 = vector.broadcast %27 : vector<1x128xf32> to vector<512x128xf32>
    %30 = arith.mulf %28, %29 : vector<512x128xf32>
    %31 = arith.addf %26, %30 : vector<512x128xf32>
    %c0_6 = arith.constant 0 : index
    %c0_7 = arith.constant 0 : index
    %32 = vector.load %arg4[%c0_6, %c0_7] : memref<512x128xbf16, #tpu.memory_space<vmem>>, vector<512x128xbf16>
    %33 = arith.extf %32 : vector<512x128xbf16> to vector<512x128xf32>
    %34 = arith.addf %31, %33 : vector<512x128xf32>
    %c0_8 = arith.constant 0 : index
    %c0_9 = arith.constant 0 : index
    %35 = vector.load %arg5[%c0_8, %c0_9] : memref<512x128xf32, #tpu.memory_space<vmem>>, vector<512x128xf32>
    tpu.vector_store %arg5[%c0_8, %c0_9], %34 {strides = array<i32>} : memref<512x128xf32, #tpu.memory_space<vmem>>, vector<512x128xf32>,
    return
  }
  func.func @transform_0(%arg0: i32) -> (i32, i32) {
    %c0_i32 = arith.constant 0 : i32
    %c0_i32_0 = arith.constant 0 : i32
    return %arg0, %c0_i32 : i32, i32
  }
  func.func @transform_1(%arg0: i32) -> (i32, i32) {
    %c0_i32 = arith.constant 0 : i32
    %c0_i32_0 = arith.constant 0 : i32
    %c0_i32_1 = arith.constant 0 : i32
    return %c0_i32, %c0_i32_0 : i32, i32
  }
  func.func @transform_2(%arg0: i32) -> (i32, i32) {
    %c0_i32 = arith.constant 0 : i32
    %c0_i32_0 = arith.constant 0 : i32
    %c0_i32_1 = arith.constant 0 : i32
    return %c0_i32, %c0_i32_0 : i32, i32
  }
  func.func @transform_3(%arg0: i32) -> (i32, i32) {
    %c0_i32 = arith.constant 0 : i32
    %c0_i32_0 = arith.constant 0 : i32
    %c0_i32_1 = arith.constant 0 : i32
    return %c0_i32, %c0_i32_0 : i32, i32
  }
  func.func @transform_4(%arg0: i32) -> (i32, i32) {
    %c0_i32 = arith.constant 0 : i32
    %c0_i32_0 = arith.constant 0 : i32
    return %arg0, %c0_i32 : i32, i32
  }
}

</mosaic_0001>

<bundles_post_ra>
// kernel: tpu_custom_call.1
= control target key start
LH: loop header
LB: loop body
LE: loop exit
PB: predicated region body
PF: predicated region fallthrough
CT: control target
= control target key end

     0   :  { %9 = vsyncpa [#allocation3], 0  ;;  %s5688_s0 = inlined_call_operand.vmem [shape: s32[2048,2], index: 0, kind: input, shape index: {}]   ;;  %s5689_s1 = inlined_call_operand.vmem [shape: bf16[64,128], index: 1, kind: input, shape index: {}]   ;;  %s5690_s2 = inlined_call_operand.vmem [shape: f32[2,128], index: 2, kind: input, shape index: {}]   ;;  %s5691_s3 = inlined_call_operand.vmem [shape: bf16[512,128], index: 3, kind: input, shape index: {}]   ;;  %s5692_s4 = inlined_call_operand.hbm [shape: f32[2048,128], index: 4, kind: output, shape index: {}]  }
   0x1   :  { %11 = vsyncpa [#allocation3 + $0x1], 0  ;;  %s3766_s15 = smov 0   ;;  %s3768_s16 = smov 0  }
   0x2   :  { %s3770_s17 = smov 0   ;;  %s3772_s18 = smov 0  }
   0x3 LB: > { %s3787_s19 = sadd.s32 4294967295, %s3733_s18   ;;  %s2785_s20 = sadd.s32 4294967294, %s3733_s18   ;;  %s3733_s18 = sphi %s3772_s18, %s6048_s18   ;;  %s3729_s17 = sphi %s3770_s17, %s6047_s17   ;;  %s3725_s16 = sphi %s3768_s16, %s6046_s16   ;;  %s3721_s15 = sphi %s3766_s15, %s6045_s15  }
   0x4   : > { %s3791_s21 = sadd.s32 1, %s3733_s18   ;;  %s113_s22 = sadd.s32 1, %s3729_s17 }
   0x5   : > { %s110_s23 = ssub.s32 %s3733_s18, %s3791_s21  ;;  %p123_p0 = scmp.ne.s32.totalorder %s3729_s17, %s3725_s16 }
   0x6   : > { %p111_p1 = scmp.eq.s32.totalorder %s110_s23, 0  ;;  %p124_p2 = scmp.eq.s32.totalorder %s3787_s19, 3 }
   0x7   : > { %p129_p3 = scmp.ne.s32.totalorder %s3725_s16, %s3721_s15  ;;  %p130_p4 = scmp.eq.s32.totalorder %s2785_s20, 3 }
   0x8   : > { %s3802_s24 = scalar_select %p111_p1, %s3729_s17, %s113_s22  }
   0x9   : > { %p3804_p5 = por %p124_p2, %p123_p0  ;;  %p3808_p6 = por %p130_p4, %p129_p3 }
   0xa   : > { %p2788_p7 = scmp.ge.s32.totalorder %s3733_s18, 1  ;;  %p166_p8 = scmp.lt.s32.totalorder %s3733_s18, 5 }
   0xc   : > { %p167_p9 = pnand %p2788_p7, %p166_p8 }
   0xe   : > { %170 = sbr.rel (%p167_p9) target bundleno = 500 (0x1f4), region = 36 }
  0x13   : > { %s2790_s27 = sshll.u32 %s3787_s19, 6  ;;  %v3669_v0 = vld [vmem:[%s5689_s1 + $0x18] sm:$0xff]   ;;  %v3735_v1 = vmov 0   ;;  %v3670_v2 = vld [vmem:[%s5689_s1 + $0x10] sm:$0xff]   ;;  %v3671_v3 = vld [vmem:[%s5689_s1 + $0x8] sm:$0xff]   ;;  %v3736_v11 = vmov 0.0  }
  0x14   : > { %3346 = vset.pattern.permute.xlu1 %v3735_v1  ;;  %3345 = vset.pattern.permute.xlu0 %v3735_v1  ;;  %p193_p10 = scmp.lt.s32.totalorder %s2790_s27, 255  ;;  %v3672_v35 = vld [vmem:[%s5689_s1] sm:$0xff]   ;;  %s189_s22 = sand.u32 1, %s3725_s16  }
  0x15   : > { %3221 = vmatprep.subr.bf16.mxu0 %v3669_v0  ;;  %3293 = vmatprep.subr.bf16.mxu1 %v3669_v0  ;;  %s2789_s30 = sshll.u32 %s189_s22, 9  ;;  %s3025_s5 = sshll.u32 %s3787_s19, 13 }
  0x16   : > { %s6050_s27 = smov (!%p193_p10, %s2790_s27), 255  ;;  %3222 = vmatpush3.bf16.msra.mxu0 %v3669_v0  ;;  %3297 = vmatpush3.bf16.msra.mxu1 %v3669_v0  ;;  %s5358_s7 = scalar_lea.vmem [#allocation2], %s2789_s30 }
  0x17   : > { %3223 = vmatprep.subr.bf16.mxu0 %v3670_v2  ;;  %3294 = vmatprep.subr.bf16.mxu1 %v3670_v2  ;;  %s2791_s6 = sshll.u32 %s6050_s27, 3  ;;  %s5640_s10 = scalar_lea.hbm %s5692_s4, %s3025_s5 }
  0x18   : > { %s3827_s11 = scalar_lea.vmem %s5688_s0, %s2791_s6  ;;  %s2723_s6 = sshll.u32 %s5358_s7, 4  ;;  %s5642_s6 = int_to_ptr.vmem [resolvable:$true] %s2723_s6 }
  0x19   : > { %v3830_v4 = vld [vmem:[%s3827_s11 + $0x10] sm:$0xff]  ;;  %v3833_v5 = vld [vmem:[%s3827_s11] sm:$0xff]  ;;  %v3838_v6 = vld [vmem:[%s3827_s11 + $0x18] sm:$0xff]  ;;  %s3673_s19 = scalar_lea.vmem %s5642_s6, 8192  ;;  %s3738_s12 = smov [#allocation2]  }
  0x1a   : > { %3224 = vmatpush3.bf16.msra.mxu0 %v3670_v2  ;;  %3298 = vmatpush3.bf16.msra.mxu1 %v3670_v2  ;;  %v3841_v7 = vld [vmem:[%s3827_s11 + $0x8] sm:$0xff]  ;;  %v3847_v9 = vld [vmem:[%s3827_s11 + $0x20] sm:$0xff]  ;;  %v3852_v10 = vld [vmem:[%s3827_s11 + $0x38] sm:$0xff]  ;;  %p3674_p11 = scmp.ne.s32.totalorder %s5642_s6, %s3673_s19  ;;  %s3677_s13 = sshll.u32 %s3738_s12, 4  ;;  %s3678_s13 = int_to_ptr.vmem [resolvable:$false] %s3677_s13 }
  0x1b   : > { %281 = vperm.xlu1 %3346, %v3830_v4   ;;  %275 = vperm.xlu0 %3345, %v3833_v5   ;;  %v3844_v8 = vld [vmem:[%s3827_s11 + $0x28] sm:$0xff]  ;;  %vm1361_vm1 = vcmp.eq.s32.totalorder %v3847_v9, 3  ;;  %vm1364_vm2 = vcmp.eq.s32.totalorder %v3852_v10, 3  ;;  %v3862_v14 = vld [vmem:[%s3827_s11 + $0x30] sm:$0xff]  ;;  %v3876_v18 = vld [vmem:[%s3827_s11 + $0x40] sm:$0xff]  ;;  %s3679_s14 = scalar_lea.vmem %s3678_s13, 16384  ;;  %p3680_p0 = scmp.lt.s32.totalorder %s5642_s6, %s3678_s13 }
  0x1c   : > { %3225 = vmatprep.subr.bf16.mxu0 %v3671_v3  ;;  %3295 = vmatprep.subr.bf16.mxu1 %v3671_v3  ;;  %vm1362_vm0 = vcmp.eq.s32.totalorder %v3844_v8, 3  ;;  %v3858_v13 = vsel %vm1361_vm1, 1.0, %v3736_v11  ;;  %v3869_v16 = vsel %vm1364_vm2, 1.0, %v3736_v11  ;;  %vm1363_vm3 = vcmp.eq.s32.totalorder %v3862_v14, 3  ;;  %v3873_v17 = vld [vmem:[%s3827_s11 + $0x48] sm:$0xff]  ;;  %v3892_v23 = vld [vmem:[%s3827_s11 + $0x58] sm:$0xff]  ;;  %p3675_p12 = pnand %p3674_p11, %p3804_p5  ;;  %p3681_p1 = scmp.lt.s32.totalorder %s3679_s14, %s3673_s19 }
  0x1d   : > { %v3855_v12 = vsel %vm1362_vm0, 1.0, %v3736_v11  ;;  %5767 = vst [vmem:[#allocation6_spill] sm:$0xff] %v3858_v13  ;;  %5768 = vst [vmem:[#allocation7_spill] sm:$0xff] %v3869_v16  ;;  %v3879_v19 = vsel %vm1363_vm3, 1.0, %v3736_v11  ;;  %vm1366_vm4 = vcmp.eq.s32.totalorder %v3873_v17, 3  ;;  %vm1365_vm5 = vcmp.eq.s32.totalorder %v3876_v18, 3 }
  0x1e   : > { %5766 = vst [vmem:[#allocation5_spill] sm:$0xff] %v3855_v12  ;;  %3226 = vmatpush3.bf16.msra.mxu0 %v3671_v3  ;;  %3299 = vmatpush3.bf16.msra.mxu1 %v3671_v3  ;;  %5769 = vst [vmem:[#allocation8_spill] sm:$0xff] %v3879_v19  ;;  %v3886_v21 = vsel %vm1366_vm4, 1.0, %v3736_v11  ;;  %v3889_v22 = vsel %vm1365_vm5, 1.0, %v3736_v11  ;;  %v3895_v24 = vld [vmem:[%s3827_s11 + $0x50] sm:$0xff]  ;;  %vm1368_vm6 = vcmp.eq.s32.totalorder %v3892_v23, 3  ;;  %p3676_p13 = pneg %p3675_p12  ;;  %p3682_p2 = por %p3681_p1, %p3680_p0 }
  0x1f   : > { %284 = vperm.xlu1 %3346, %v3838_v6   ;;  %278 = vperm.xlu0 %3345, %v3841_v7   ;;  %5770 = vst [vmem:[#allocation9_spill] sm:$0xff] %v3886_v21  ;;  %5771 = vst [vmem:[#allocation10_spill] sm:$0xff] %v3889_v22  ;;  %vm1367_vm7 = vcmp.eq.s32.totalorder %v3895_v24, 3  ;;  %v3904_v26 = vsel %vm1368_vm6, 1.0, %v3736_v11  ;;  %v3910_v28 = vld [vmem:[%s3827_s11 + $0x68] sm:$0xff]  ;;  %v3913_v29 = vld [vmem:[%s3827_s11 + $0x60] sm:$0xff] }
  0x20   : > { %5772 = vst [vmem:[#allocation11_spill] sm:$0xff] %v3904_v26  ;;  %v3907_v27 = vsel %vm1367_vm7, 1.0, %v3736_v11  ;;  %vm1370_vm8 = vcmp.eq.s32.totalorder %v3910_v28, 3  ;;  %vm1369_vm9 = vcmp.eq.s32.totalorder %v3913_v29, 3  ;;  %v3920_v31 = vld [vmem:[%s3827_s11 + $0x78] sm:$0xff]  ;;  %v3930_v34 = vld [vmem:[%s3827_s11 + $0x70] sm:$0xff]  ;;  %3227 = vmatprep.subr.bf16.mxu0 %v3672_v35  ;;  %3296 = vmatprep.subr.bf16.mxu1 %v3672_v35  ;;  %p3683_p3 = pnand %p3682_p2, %p3676_p13 }
  0x21   : > { %5773 = vst [vmem:[#allocation12_spill] sm:$0xff] %v3907_v27  ;;  %v3923_v32 = vsel %vm1370_vm8, 1.0, %v3736_v11  ;;  %v3926_v33 = vsel %vm1369_vm9, 1.0, %v3736_v11  ;;  %vm1372_vm10 = vcmp.eq.s32.totalorder %v3920_v31, 3  ;;  %vm1371_vm11 = vcmp.eq.s32.totalorder %v3930_v34, 3  ;;  %v3939_v37 = vld [vmem:[%s3827_s11 + $0x88] sm:$0xff] }
  0x22   : > { %5774 = vst [vmem:[#allocation13_spill] sm:$0xff] %v3923_v32  ;;  %5775 = vst [vmem:[#allocation14_spill] sm:$0xff] %v3926_v33  ;;  %v3935_v36 = vsel %vm1372_vm10, 1.0, %v3736_v11  ;;  %v3942_v38 = vld [vmem:[%s3827_s11 + $0x80] sm:$0xff]  ;;  %v3947_v39 = vsel %vm1371_vm11, 1.0, %v3736_v11  ;;  %vm1374_vm12 = vcmp.eq.s32.totalorder %v3939_v37, 3  ;;  %3228 = vmatpush3.bf16.msra.mxu0 %v3672_v35  ;;  %3300 = vmatpush3.bf16.msra.mxu1 %v3672_v35 }
  0x23   : > { %290 = vperm.xlu1 %3346, %v3844_v8   ;;  %287 = vperm.xlu0 %3345, %v3847_v9   ;;  %5776 = vst [vmem:[#allocation15_spill] sm:$0xff] %v3935_v36  ;;  %5777 = vst [vmem:[#allocation16_spill] sm:$0xff] %v3947_v39  ;;  %vm1373_vm13 = vcmp.eq.s32.totalorder %v3942_v38, 3  ;;  %v3954_v41 = vsel %vm1374_vm12, 1.0, %v3736_v11  ;;  %v3960_v43 = vld [vmem:[%s3827_s11 + $0x98] sm:$0xff]  ;;  %v3963_v44 = vld [vmem:[%s3827_s11 + $0x90] sm:$0xff] }
  0x24   : > { %5778 = vst [vmem:[#allocation17_spill] sm:$0xff] %v3954_v41  ;;  %v3957_v42 = vsel %vm1373_vm13, 1.0, %v3736_v11  ;;  %vm1376_vm14 = vcmp.eq.s32.totalorder %v3960_v43, 3  ;;  %vm1375_vm15 = vcmp.eq.s32.totalorder %v3963_v44, 3  ;;  %v3976_v48 = vld [vmem:[%s3827_s11 + $0xa8] sm:$0xff]  ;;  %v3979_v49 = vld [vmem:[%s3827_s11 + $0xa0] sm:$0xff] }
  0x25   : > { %5779 = vst [vmem:[#allocation18_spill] sm:$0xff] %v3957_v42  ;;  %v3970_v46 = vsel %vm1376_vm14, 1.0, %v3736_v11  ;;  %v3973_v47 = vsel %vm1375_vm15, 1.0, %v3736_v11  ;;  %vm1378_vm0 = vcmp.eq.s32.totalorder %v3976_v48, 3  ;;  %vm1377_vm1 = vcmp.eq.s32.totalorder %v3979_v49, 3  ;;  %v3988_v51 = vld [vmem:[%s3827_s11 + $0xb8] sm:$0xff] }
  0x26   : > { %5780 = vst [vmem:[#allocation19_spill] sm:$0xff] %v3970_v46  ;;  %5781 = vst [vmem:[#allocation20_spill] sm:$0xff] %v3973_v47  ;;  %v3991_v52 = vsel %vm1378_vm0, 1.0, %v3736_v11  ;;  %v3994_v53 = vsel %vm1377_vm1, 1.0, %v3736_v11  ;;  %vm1380_vm2 = vcmp.eq.s32.totalorder %v3988_v51, 3  ;;  %v3998_v54 = vld [vmem:[%s3827_s11 + $0xb0] sm:$0xff] }
  0x27   : > { %296 = vperm.xlu1 %3346, %v3852_v10   ;;  %293 = vperm.xlu0 %3345, %v3862_v14   ;;  %5782 = vst [vmem:[#allocation21_spill] sm:$0xff] %v3991_v52  ;;  %5783 = vst [vmem:[#allocation22_spill] sm:$0xff] %v3994_v53  ;;  %v4003_v56 = vsel %vm1380_vm2, 1.0, %v3736_v11  ;;  %vm1379_vm3 = vcmp.eq.s32.totalorder %v3998_v54, 3  ;;  %v4007_v57 = vld [vmem:[%s3827_s11 + $0xc8] sm:$0xff]  ;;  %v4010_v58 = vld [vmem:[%s3827_s11 + $0xc0] sm:$0xff] }
  0x28   : > { %5784 = vst [vmem:[#allocation23_spill] sm:$0xff] %v4003_v56  ;;  %v4013_v59 = vsel %vm1379_vm3, 1.0, %v3736_v11  ;;  %vm1382_vm4 = vcmp.eq.s32.totalorder %v4007_v57, 3  ;;  %vm1381_vm5 = vcmp.eq.s32.totalorder %v4010_v58, 3  ;;  %v4028_v63 = vld [vmem:[%s3827_s11 + $0xd8] sm:$0xff]  ;;  %v4031_v0 = vld [vmem:[%s3827_s11 + $0xd0] sm:$0xff] }
  0x29   : > { %5785 = vst [vmem:[#allocation24_spill] sm:$0xff] %v4013_v59  ;;  %v4022_v61 = vsel %vm1382_vm4, 1.0, %v3736_v11  ;;  %v4025_v62 = vsel %vm1381_vm5, 1.0, %v3736_v11  ;;  %vm1384_vm6 = vcmp.eq.s32.totalorder %v4028_v63, 3  ;;  %vm1383_vm7 = vcmp.eq.s32.totalorder %v4031_v0, 3  ;;  %v4044_v60 = vld [vmem:[%s3827_s11 + $0xe8] sm:$0xff] }
  0x2a   : > { %5786 = vst [vmem:[#allocation25_spill] sm:$0xff] %v4022_v61  ;;  %5787 = vst [vmem:[#allocation26_spill] sm:$0xff] %v4025_v62  ;;  %v4038_v2 = vsel %vm1384_vm6, 1.0, %v3736_v11  ;;  %v4041_v3 = vsel %vm1383_vm7, 1.0, %v3736_v11  ;;  %v4047_v55 = vld [vmem:[%s3827_s11 + $0xe0] sm:$0xff]  ;;  %vm1386_vm8 = vcmp.eq.s32.totalorder %v4044_v60, 3 }
  0x2b   : > { %302 = vperm.xlu1 %3346, %v3873_v17   ;;  %299 = vperm.xlu0 %3345, %v3876_v18   ;;  %5788 = vst [vmem:[#allocation27_spill] sm:$0xff] %v4038_v2  ;;  %5789 = vst [vmem:[#allocation28_spill] sm:$0xff] %v4041_v3  ;;  %vm1385_vm9 = vcmp.eq.s32.totalorder %v4047_v55, 3  ;;  %v4054_v50 = vld [vmem:[%s3827_s11 + $0xf8] sm:$0xff]  ;;  %v4059_v45 = vsel %vm1386_vm8, 1.0, %v3736_v11  ;;  %v4066_v1 = vld [vmem:[%s3827_s11 + $0xf0] sm:$0xff] }
  0x2c   : > { %5790 = vst [vmem:[#allocation29_spill] sm:$0xff] %v4059_v45  ;;  %v4062_v40 = vsel %vm1385_vm9, 1.0, %v3736_v11  ;;  %vm1388_vm10 = vcmp.eq.s32.totalorder %v4054_v50, 3  ;;  %vm1387_vm11 = vcmp.eq.s32.totalorder %v4066_v1, 3  ;;  %v4078_v20 = vld [vmem:[%s3827_s11 + $0x108] sm:$0xff]  ;;  %v4081_v15 = vld [vmem:[%s3827_s11 + $0x100] sm:$0xff] }
  0x2d   : > { %5791 = vst [vmem:[#allocation30_spill] sm:$0xff] %v4062_v40  ;;  %v4074_v25 = vsel %vm1388_vm10, 1.0, %v3736_v11  ;;  %v4084_v3 = vsel %vm1387_vm11, 1.0, %v3736_v11  ;;  %vm1390_vm12 = vcmp.eq.s32.totalorder %v4078_v20, 3  ;;  %vm1389_vm13 = vcmp.eq.s32.totalorder %v4081_v15, 3  ;;  %v4097_v2 = vld [vmem:[%s3827_s11 + $0x118] sm:$0xff] }
  0x2e   : > { %5792 = vst [vmem:[#allocation31_spill] sm:$0xff] %v4074_v25  ;;  %5793 = vst [vmem:[#allocation32_spill] sm:$0xff] %v4084_v3  ;;  %v4091_v40 = vsel %vm1390_vm12, 1.0, %v3736_v11  ;;  %v4094_v45 = vsel %vm1389_vm13, 1.0, %v3736_v11  ;;  %v4100_v62 = vld [vmem:[%s3827_s11 + $0x110] sm:$0xff]  ;;  %vm1392_vm14 = vcmp.eq.s32.totalorder %v4097_v2, 3 }
  0x2f   : > { %308 = vperm.xlu1 %3346, %v3892_v23   ;;  %305 = vperm.xlu0 %3345, %v3895_v24   ;;  %5794 = vst [vmem:[#allocation33_spill] sm:$0xff] %v4091_v40  ;;  %5795 = vst [vmem:[#allocation34_spill] sm:$0xff] %v4094_v45  ;;  %vm1391_vm15 = vcmp.eq.s32.totalorder %v4100_v62, 3  ;;  %v4109_v3 = vsel %vm1392_vm14, 1.0, %v3736_v11  ;;  %v4115_v35 = vld [vmem:[%s3827_s11 + $0x128] sm:$0xff]  ;;  %v4118_v61 = vld [vmem:[%s3827_s11 + $0x120] sm:$0xff] }
  0x30   : > { %5796 = vst [vmem:[#allocation35_spill] sm:$0xff] %v4109_v3  ;;  %v4112_v25 = vsel %vm1391_vm15, 1.0, %v3736_v11  ;;  %vm1394_vm0 = vcmp.eq.s32.totalorder %v4115_v35, 3  ;;  %vm1393_vm1 = vcmp.eq.s32.totalorder %v4118_v61, 3  ;;  %v4125_v30 = vld [vmem:[%s3827_s11 + $0x138] sm:$0xff]  ;;  %v4135_v56 = vld [vmem:[%s3827_s11 + $0x130] sm:$0xff] }
  0x31   : > { %5797 = vst [vmem:[#allocation36_spill] sm:$0xff] %v4112_v25  ;;  %v4128_v45 = vsel %vm1394_vm0, 1.0, %v3736_v11  ;;  %v4131_v40 = vsel %vm1393_vm1, 1.0, %v3736_v11  ;;  %vm1396_vm2 = vcmp.eq.s32.totalorder %v4125_v30, 3  ;;  %vm1395_vm3 = vcmp.eq.s32.totalorder %v4135_v56, 3  ;;  %v4146_v3 = vld [vmem:[%s3827_s11 + $0x148] sm:$0xff] }
  0x32   : > { %5798 = vst [vmem:[#allocation37_spill] sm:$0xff] %v4128_v45  ;;  %5799 = vst [vmem:[#allocation38_spill] sm:$0xff] %v4131_v40  ;;  %v4142_v25 = vsel %vm1396_vm2, 1.0, %v3736_v11  ;;  %v4149_v53 = vld [vmem:[%s3827_s11 + $0x140] sm:$0xff]  ;;  %v4152_v52 = vsel %vm1395_vm3, 1.0, %v3736_v11  ;;  %vm1398_vm4 = vcmp.eq.s32.totalorder %v4146_v3, 3 }
  0x33   : > { %314 = vperm.xlu1 %3346, %v3910_v28   ;;  %311 = vperm.xlu0 %3345, %v3913_v29   ;;  %5800 = vst [vmem:[#allocation39_spill] sm:$0xff] %v4142_v25  ;;  %5801 = vst [vmem:[#allocation40_spill] sm:$0xff] %v4152_v52  ;;  %vm1397_vm5 = vcmp.eq.s32.totalorder %v4149_v53, 3  ;;  %v4159_v40 = vsel %vm1398_vm4, 1.0, %v3736_v11  ;;  %v4165_v47 = vld [vmem:[%s3827_s11 + $0x158] sm:$0xff]  ;;  %v4168_v46 = vld [vmem:[%s3827_s11 + $0x150] sm:$0xff] }
  0x34   : > { %5802 = vst [vmem:[#allocation41_spill] sm:$0xff] %v4159_v40  ;;  %v4162_v45 = vsel %vm1397_vm5, 1.0, %v3736_v11  ;;  %vm1400_vm6 = vcmp.eq.s32.totalorder %v4165_v47, 3  ;;  %vm1399_vm7 = vcmp.eq.s32.totalorder %v4168_v46, 3  ;;  %v4183_v25 = vld [vmem:[%s3827_s11 + $0x168] sm:$0xff]  ;;  %v4186_v42 = vld [vmem:[%s3827_s11 + $0x160] sm:$0xff] }
  0x35   : > { %5803 = vst [vmem:[#allocation42_spill] sm:$0xff] %v4162_v45  ;;  %v4177_v59 = vsel %vm1400_vm6, 1.0, %v3736_v11  ;;  %v4180_v52 = vsel %vm1399_vm7, 1.0, %v3736_v11  ;;  %vm1402_vm8 = vcmp.eq.s32.totalorder %v4183_v25, 3  ;;  %vm1401_vm9 = vcmp.eq.s32.totalorder %v4186_v42, 3  ;;  %v4193_v40 = vld [vmem:[%s3827_s11 + $0x178] sm:$0xff] }
  0x36   : > { %5804 = vst [vmem:[#allocation43_spill] sm:$0xff] %v4177_v59  ;;  %5805 = vst [vmem:[#allocation44_spill] sm:$0xff] %v4180_v52  ;;  %v4196_v41 = vsel %vm1402_vm8, 1.0, %v3736_v11  ;;  %v4199_v39 = vsel %vm1401_vm9, 1.0, %v3736_v11  ;;  %vm1404_vm10 = vcmp.eq.s32.totalorder %v4193_v40, 3  ;;  %v4203_v36 = vld [vmem:[%s3827_s11 + $0x170] sm:$0xff] }
  0x37   : > { %320 = vperm.xlu1 %3346, %v3920_v31   ;;  %317 = vperm.xlu0 %3345, %v3930_v34   ;;  %5806 = vst [vmem:[#allocation45_spill] sm:$0xff] %v4196_v41  ;;  %5807 = vst [vmem:[#allocation46_spill] sm:$0xff] %v4199_v39  ;;  %v4208_v52 = vsel %vm1404_vm10, 1.0, %v3736_v11  ;;  %vm1403_vm11 = vcmp.eq.s32.totalorder %v4203_v36, 3  ;;  %v4212_v59 = vld [vmem:[%s3827_s11 + $0x188] sm:$0xff]  ;;  %v4215_v33 = vld [vmem:[%s3827_s11 + $0x180] sm:$0xff] }
  0x38   : > { %5808 = vst [vmem:[#allocation47_spill] sm:$0xff] %v4208_v52  ;;  %v4220_v32 = vsel %vm1403_vm11, 1.0, %v3736_v11  ;;  %vm1406_vm12 = vcmp.eq.s32.totalorder %v4212_v59, 3  ;;  %vm1405_vm13 = vcmp.eq.s32.totalorder %v4215_v33, 3  ;;  %v4233_v27 = vld [vmem:[%s3827_s11 + $0x198] sm:$0xff]  ;;  %v4236_v26 = vld [vmem:[%s3827_s11 + $0x190] sm:$0xff] }
  0x39   : > { %5809 = vst [vmem:[#allocation48_spill] sm:$0xff] %v4220_v32  ;;  %v4227_v39 = vsel %vm1406_vm12, 1.0, %v3736_v11  ;;  %v4230_v41 = vsel %vm1405_vm13, 1.0, %v3736_v11  ;;  %vm1408_vm14 = vcmp.eq.s32.totalorder %v4233_v27, 3  ;;  %vm1407_vm15 = vcmp.eq.s32.totalorder %v4236_v26, 3  ;;  %v4249_v52 = vld [vmem:[%s3827_s11 + $0x1a8] sm:$0xff] }
  0x3a   : > { %5810 = vst [vmem:[#allocation49_spill] sm:$0xff] %v4227_v39  ;;  %5811 = vst [vmem:[#allocation50_spill] sm:$0xff] %v4230_v41  ;;  %v4243_v45 = vsel %vm1408_vm14, 1.0, %v3736_v11  ;;  %v4246_v32 = vsel %vm1407_vm15, 1.0, %v3736_v11  ;;  %v4252_v21 = vld [vmem:[%s3827_s11 + $0x1a0] sm:$0xff]  ;;  %vm1410_vm0 = vcmp.eq.s32.totalorder %v4249_v52, 3 }
  0x3b   : > { %326 = vperm.xlu1 %3346, %v3939_v37   ;;  %323 = vperm.xlu0 %3345, %v3942_v38   ;;  %5812 = vst [vmem:[#allocation51_spill] sm:$0xff] %v4243_v45  ;;  %5813 = vst [vmem:[#allocation52_spill] sm:$0xff] %v4246_v32  ;;  %vm1409_vm1 = vcmp.eq.s32.totalorder %v4252_v21, 3  ;;  %v4261_v41 = vld [vmem:[%s3827_s11 + $0x1b8] sm:$0xff]  ;;  %v4264_v39 = vsel %vm1410_vm0, 1.0, %v3736_v11  ;;  %v4271_v16 = vld [vmem:[%s3827_s11 + $0x1b0] sm:$0xff] }
  0x3c   : > { %5814 = vst [vmem:[#allocation53_spill] sm:$0xff] %v4264_v39  ;;  %v4267_v19 = vsel %vm1409_vm1, 1.0, %v3736_v11  ;;  %vm1412_vm2 = vcmp.eq.s32.totalorder %v4261_v41, 3  ;;  %vm1411_vm3 = vcmp.eq.s32.totalorder %v4271_v16, 3  ;;  %vm1167_vm4 = vcmp.eq.s32.totalorder %v3830_v4, 2 }
  0x3d   : > { %5815 = vst [vmem:[#allocation54_spill] sm:$0xff] %v4267_v19  ;;  %v4276_v22 = vsel %vm1412_vm2, 1.0, %v3736_v11  ;;  %vm1165_vm5 = vcmp.eq.s32.totalorder %v3833_v5, 2  ;;  %vm1168_vm6 = vcmp.eq.s32.totalorder %v3838_v6, 2  ;;  %v4283_v32 = vsel %vm1411_vm3, 1.0, %v3736_v11 }
  0x3e   : > { %5816 = vst [vmem:[#allocation55_spill] sm:$0xff] %v4276_v22  ;;  %5817 = vst [vmem:[#allocation56_spill] sm:$0xff] %v4283_v32  ;;  %vm1166_vm7 = vcmp.eq.s32.totalorder %v3841_v7, 2  ;;  %vm1170_vm8 = vcmp.eq.s32.totalorder %v3844_v8, 2  ;;  %vm1169_vm9 = vcmp.eq.s32.totalorder %v3847_v9, 2  ;;  %vm1178_vm0 = vcmp.eq.s32.totalorder %v3910_v28, 2 }
  0x3f   : > { %332 = vperm.xlu1 %3346, %v3960_v43   ;;  %329 = vperm.xlu0 %3345, %v3963_v44   ;;  %vm1177_vm1 = vcmp.eq.s32.totalorder %v3913_v29, 2  ;;  %vm1185_vm15 = vcmp.eq.s32.totalorder %v3979_v49, 2  ;;  %vm1188_vm2 = vcmp.eq.s32.totalorder %v3988_v51, 2  ;;  %vm1187_vm3 = vcmp.eq.s32.totalorder %v3998_v54, 2 }
  0x40   : > { %vm1190_vm10 = vcmp.eq.s32.totalorder %v4007_v57, 2  ;;  %vm1189_vm11 = vcmp.eq.s32.totalorder %v4010_v58, 2  ;;  %v4320_v13 = vsel %vm1167_vm4, 1.0, %v3736_v11  ;;  %v4325_v32 = vsel %vm1168_vm6, 1.0, %v3736_v11 }
  0x41   : > { %5818 = vst [vmem:[#allocation57_spill] sm:$0xff] %v4320_v13  ;;  %v4330_v22 = vsel %vm1165_vm5, 1.0, %v3736_v11  ;;  %vm1194_vm12 = vcmp.eq.s32.totalorder %v4044_v60, 2  ;;  %vm1195_vm14 = vcmp.eq.s32.totalorder %v4066_v1, 2  ;;  %v4340_v39 = vsel %vm1166_vm7, 1.0, %v3736_v11 }
  0x42   : > { %v4351_v19 = vsel %vm1169_vm9, 1.0, %v3736_v11  ;;  %v4356_v12 = vsel %vm1170_vm8, 1.0, %v3736_v11  ;;  %vm5819_vm5 = vcmp.eq.s32.totalorder %v3862_v14, 2  ;;  %vm5820_vm9 = vcmp.eq.s32.totalorder %v3852_v10, 2 }
  0x43   : > { %338 = vperm.xlu1 %3346, %v3976_v48   ;;  %335 = vperm.xlu0 %3345, %v3979_v49   ;;  %v4366_v9 = vsel %vm5819_vm5, 1.0, %v3736_v11  ;;  %v4371_v8 = vsel %vm5820_vm9, 1.0, %v3736_v11  ;;  %vm5821_vm8 = vcmp.eq.s32.totalorder %v3876_v18, 2  ;;  %vm1202_vm4 = vcmp.eq.s32.totalorder %v4115_v35, 2 }
  0x44   : > { %v4376_v45 = vsel %vm5821_vm8, 1.0, %v3736_v11  ;;  %vm1203_vm7 = vcmp.eq.s32.totalorder %v4135_v56, 2  ;;  %vm5822_vm5 = vcmp.eq.s32.totalorder %v3873_v17, 2  ;;  %vm1205_vm13 = vcmp.eq.s32.totalorder %v4149_v53, 2 }
  0x45   : > { %v4386_v10 = vsel %vm5822_vm5, 1.0, %v3736_v11  ;;  %vm5823_vm8 = vcmp.eq.s32.totalorder %v3895_v24, 2  ;;  %vm5824_vm6 = vcmp.eq.s32.totalorder %v3892_v23, 2  ;;  %v4405_v17 = vsel %vm1177_vm1, 1.0, %v3736_v11 }
  0x46   : > { %v4395_v13 = vsel %vm5823_vm8, 1.0, %v3736_v11  ;;  %v4400_v14 = vsel %vm5824_vm6, 1.0, %v3736_v11  ;;  %v4417_v24 = vsel %vm1178_vm0, 1.0, %v3736_v11  ;;  %vm5825_vm1 = vcmp.eq.s32.totalorder %v3930_v34, 2 }
  0x47   : > { %344 = vperm.xlu1 %3346, %v3988_v51   ;;  %341 = vperm.xlu0 %3345, %v3998_v54   ;;  %v4422_v29 = vsel %vm5825_vm1, 1.0, %v3736_v11  ;;  %vm5826_vm6 = vcmp.eq.s32.totalorder %v3920_v31, 2  ;;  %vm1210_vm8 = vcmp.eq.s32.totalorder %v4183_v25, 2  ;;  %vm5827_vm0 = vcmp.eq.s32.totalorder %v3942_v38, 2 }
  0x48   : > { %v4427_v18 = vsel %vm5826_vm6, 1.0, %v3736_v11  ;;  %v4439_v34 = vsel %vm5827_vm0, 1.0, %v3736_v11  ;;  %vm5828_vm1 = vcmp.eq.s32.totalorder %v3939_v37, 2  ;;  %vm5829_vm9 = vcmp.eq.s32.totalorder %v3963_v44, 2 }
  0x49   : > { %v4444_v31 = vsel %vm5828_vm1, 1.0, %v3736_v11  ;;  %v4453_v23 = vsel %vm5829_vm9, 1.0, %v3736_v11  ;;  %vm5831_vm0 = vcmp.eq.s32.totalorder %v3960_v43, 2  ;;  %v4463_v37 = vsel %vm1185_vm15, 1.0, %v3736_v11 }
  0x4a   : > { %5830 = vst [vmem:[#allocation58_spill] sm:$0xff] %v4453_v23  ;;  %v4458_v38 = vsel %vm5831_vm0, 1.0, %v3736_v11  ;;  %vm1216_vm1 = vcmp.eq.s32.totalorder %v4233_v27, 2  ;;  %vm1215_vm6 = vcmp.eq.s32.totalorder %v4236_v26, 2  ;;  %vm1217_vm5 = vcmp.eq.s32.totalorder %v4252_v21, 2 }
  0x4b   : > { %350 = vperm.xlu1 %3346, %v4007_v57   ;;  %347 = vperm.xlu0 %3345, %v4010_v58   ;;  %vm5832_vm9 = vcmp.eq.s32.totalorder %v3976_v48, 2  ;;  %v4478_v49 = vsel %vm1187_vm3, 1.0, %v3736_v11  ;;  %v4483_v28 = vsel %vm1188_vm2, 1.0, %v3736_v11  ;;  %vm1218_vm15 = vcmp.eq.s32.totalorder %v4249_v52, 2 }
  0x4c   : > { %v4473_v43 = vsel %vm5832_vm9, 1.0, %v3736_v11  ;;  %vm1220_vm0 = vcmp.eq.s32.totalorder %v4261_v41, 2  ;;  %vm1219_vm9 = vcmp.eq.s32.totalorder %v4271_v16, 2  ;;  %v4497_v51 = vsel %vm1189_vm11, 1.0, %v3736_v11 }
  0x4d   : > { %v4502_v44 = vsel %vm1190_vm10, 1.0, %v3736_v11  ;;  %vm5833_vm2 = vcmp.eq.s32.totalorder %v4031_v0, 2  ;;  %vm5834_vm3 = vcmp.eq.s32.totalorder %v4028_v63, 2  ;;  %vm5835_vm11 = vcmp.eq.s32.totalorder %v4047_v55, 2 }
  0x4e   : > { %v4509_v48 = vsel %vm5833_vm2, 1.0, %v3736_v11  ;;  %v4514_v54 = vsel %vm5834_vm3, 1.0, %v3736_v11  ;;  %v4519_v58 = vsel %vm5835_vm11, 1.0, %v3736_v11  ;;  %v4526_v23 = vsel %vm1194_vm12, 1.0, %v3736_v11 }
  0x4f   : > { %356 = vperm.xlu1 %3346, %v4028_v63   ;;  %353 = vperm.xlu0 %3345, %v4031_v0   ;;  %v4531_v0 = vsel %vm1195_vm14, 1.0, %v3736_v11  ;;  %vm5836_vm10 = vcmp.eq.s32.totalorder %v4054_v50, 2  ;;  %vm5837_vm12 = vcmp.eq.s32.totalorder %v4081_v15, 2  ;;  %vm5839_vm14 = vcmp.eq.s32.totalorder %v4078_v20, 2 }
  0x50   : > { %v4536_v63 = vsel %vm5836_vm10, 1.0, %v3736_v11  ;;  %vm5841_vm2 = vcmp.eq.s32.totalorder %v4100_v62, 2  ;;  %vm5843_vm3 = vcmp.eq.s32.totalorder %v4097_v2, 2  ;;  %vm5845_vm11 = vcmp.eq.s32.totalorder %v4118_v61, 2 }
  0x51   : > { %v4559_v57 = vsel %vm5841_vm2, 1.0, %v3736_v11  ;;  %vm5847_vm10 = vcmp.eq.s32.totalorder %v4125_v30, 2  ;;  %vm5859_vm2 = vcmp.eq.s32.totalorder %v4193_v40, 2 }
  0x52   : > { %5842 = vst [vmem:[#allocation61_spill] sm:$0xff] %v4559_v57  ;;  %v4595_v57 = vsel %vm1205_vm13, 1.0, %v3736_v11  ;;  %vm5856_vm13 = vcmp.eq.s32.totalorder %v4186_v42, 2 }
  0x53   : > { %362 = vperm.xlu1 %3346, %v4044_v60   ;;  %359 = vperm.xlu0 %3345, %v4047_v55   ;;  %v4545_v60 = vsel %vm5837_vm12, 1.0, %v3736_v11  ;;  %5849 = vst [vmem:[#allocation65_spill] sm:$0xff] %v4595_v57  ;;  %vm5854_vm12 = vcmp.eq.s32.totalorder %v4165_v47, 2  ;;  %v4626_v57 = vsel %vm1210_vm8, 1.0, %v3736_v11  ;;  %vm5861_vm8 = vcmp.eq.s32.totalorder %v4215_v33, 2 }
  0x54   : > { %5838 = vst [vmem:[#allocation59_spill] sm:$0xff] %v4545_v60  ;;  %v4612_v55 = vsel %vm5854_vm12, 1.0, %v3736_v11 }
  0x55   : > { %5855 = vst [vmem:[#allocation68_spill] sm:$0xff] %v4612_v55  ;;  %v4674_v55 = vsel %vm1218_vm15, 1.0, %v3736_v11  ;;  %vm1360_vm15 = vcmp.eq.s32.totalorder %v3838_v6, 3 }
  0x57   : > { %368 = vperm.xlu1 %3346, %v4054_v50   ;;  %365 = vperm.xlu0 %3345, %v4066_v1   ;;  %v4550_v1 = vsel %vm5839_vm14, 1.0, %v3736_v11  ;;  %v4576_v50 = vsel %vm1202_vm4, 1.0, %v3736_v11  ;;  %vm5850_vm4 = vcmp.eq.s32.totalorder %v4146_v3, 2  ;;  %vm5857_vm14 = vcmp.eq.s32.totalorder %v4203_v36, 2 }
  0x58   : > { %5840 = vst [vmem:[#allocation60_spill] sm:$0xff] %v4550_v1  ;;  %v4645_v1 = vsel %vm5861_vm8, 1.0, %v3736_v11 }
  0x59   : > { %5862 = vst [vmem:[#allocation71_spill] sm:$0xff] %v4645_v1  ;;  %v4679_v1 = vsel %vm1219_vm9, 1.0, %v3736_v11 }
  0x5b   : > { %374 = vperm.xlu1 %3346, %v4078_v20   ;;  %371 = vperm.xlu0 %3345, %v4081_v15   ;;  %v4564_v15 = vsel %vm5843_vm3, 1.0, %v3736_v11  ;;  %v4569_v20 = vsel %vm5845_vm11, 1.0, %v3736_v11  ;;  %vm5863_vm3 = vcmp.eq.s32.totalorder %v4212_v59, 2 }
  0x5c   : > { %5844 = vst [vmem:[#allocation62_spill] sm:$0xff] %v4564_v15  ;;  %v4600_v15 = vsel %vm5850_vm4, 1.0, %v3736_v11  ;;  %vm714_vm4 = vcmask 523264  }
  0x5d   : > { %5851 = vst [vmem:[#allocation66_spill] sm:$0xff] %v4600_v15  ;;  %v4631_v15 = vsel %vm5857_vm14, 1.0, %v3736_v11 }
  0x5e   : > { %5858 = vst [vmem:[#allocation69_spill] sm:$0xff] %v4631_v15  ;;  %v4667_v15 = vsel %vm1217_vm5, 1.0, %v3736_v11  ;;  %vm1357_vm5 = vcmp.eq.s32.totalorder %v3833_v5, 3 }
  0x5f   : > { %380 = vperm.xlu1 %3346, %v4097_v2   ;;  %377 = vperm.xlu0 %3345, %v4100_v62   ;;  %v4581_v62 = vsel %vm1203_vm7, 1.0, %v3736_v11  ;;  %v4586_v2 = vsel %vm5847_vm10, 1.0, %v3736_v11  ;;  %vm5852_vm7 = vcmp.eq.s32.totalorder %v4168_v46, 2 }
  0x60   : > { %5846 = vst [vmem:[#allocation63_spill] sm:$0xff] %v4581_v62  ;;  %5848 = vst [vmem:[#allocation64_spill] sm:$0xff] %v4586_v2  ;;  %v4607_v60 = vsel %vm5852_vm7, 1.0, %v3736_v11  ;;  %v4617_v62 = vsel %vm5856_vm13, 1.0, %v3736_v11  ;;  %v4636_v2 = vsel %vm5859_vm2, 1.0, %v3736_v11 }
  0x61   : > { %5853 = vst [vmem:[#allocation67_spill] sm:$0xff] %v4607_v60  ;;  %5860 = vst [vmem:[#allocation70_spill] sm:$0xff] %v4636_v2  ;;  %v4650_v60 = vsel %vm5863_vm3, 1.0, %v3736_v11  ;;  %v3479_v2 = vpack.i.bf16 %v4674_v55, %v4667_v15 }
  0x62   : > { %5864 = vst [vmem:[#allocation72_spill] sm:$0xff] %v4650_v60  ;;  %v4684_v60 = vsel %vm1220_vm0, 1.0, %v3736_v11 }
  0x63   : > { %386 = vperm.xlu1 %3346, %v4115_v35   ;;  %383 = vperm.xlu0 %3345, %v4118_v61   ;;  %v4657_v61 = vsel %vm1215_vm6, 1.0, %v3736_v11  ;;  %v4662_v35 = vsel %vm1216_vm1, 1.0, %v3736_v11  ;;  %vm1358_vm6 = vcmp.eq.s32.totalorder %v3841_v7, 3  ;;  %vm1359_vm1 = vcmp.eq.s32.totalorder %v3830_v4, 3 }
  0x64   : > { %5865 = vst [vmem:[#allocation73_spill] sm:$0xff] %v4657_v61  ;;  %5866 = vst [vmem:[#allocation74_spill] sm:$0xff] %v4662_v35  ;;  %v4697_v35 = vsel %vm1357_vm5, 1.0, %v3736_v11  ;;  %v4700_v5 = vsel %vm1358_vm6, 1.0, %v3736_v11  ;;  %v4710_v4 = vsel %vm1360_vm15, 1.0, %v3736_v11 }
  0x67   : > { %392 = vperm.xlu1 %3346, %v4125_v30   ;;  %389 = vperm.xlu0 %3345, %v4135_v56   ;;  %v4707_v30 = vsel %vm1359_vm1, 1.0, %v3736_v11  ;;  %v3737_v56 = vmov 1  }
  0x6b   : > { %398 = vperm.xlu1 %3346, %v4146_v3   ;;  %395 = vperm.xlu0 %3345, %v4149_v53  }
  0x6f   : > { %404 = vperm.xlu1 %3346, %v4165_v47   ;;  %401 = vperm.xlu0 %3345, %v4168_v46  }
  0x73   : > { %410 = vperm.xlu1 %3346, %v4183_v25   ;;  %407 = vperm.xlu0 %3345, %v4186_v42   ;;  %v4729_v25 = vld [vmem:[%s3827_s11 + $0x1c8] sm:$0xff] }
  0x77   : > { %416 = vperm.xlu1 %3346, %v4193_v40   ;;  %413 = vperm.xlu0 %3345, %v4203_v36   ;;  %v4732_v36 = vld [vmem:[%s3827_s11 + $0x1c0] sm:$0xff]  ;;  %v4753_v40 = vld [vmem:[%s3827_s11 + $0x1f8] sm:$0xff] }
  0x7b   : > { %422 = vperm.xlu1 %3346, %v4212_v59   ;;  %419 = vperm.xlu0 %3345, %v4215_v33   ;;  %v4748_v33 = vld [vmem:[%s3827_s11 + $0x1e0] sm:$0xff] }
  0x7f   : > { %428 = vperm.xlu1 %3346, %v4233_v27   ;;  %425 = vperm.xlu0 %3345, %v4236_v26   ;;  %v4737_v27 = vld [vmem:[%s3827_s11 + $0x1d8] sm:$0xff]  ;;  %v4740_v26 = vld [vmem:[%s3827_s11 + $0x1d0] sm:$0xff] }
  0x83   : > { %434 = vperm.xlu1 %3346, %v4249_v52   ;;  %431 = vperm.xlu0 %3345, %v4252_v21   ;;  %v4745_v21 = vld [vmem:[%s3827_s11 + $0x1e8] sm:$0xff] }
  0x87   : > { %440 = vperm.xlu1 %3346, %v4261_v41   ;;  %437 = vperm.xlu0 %3345, %v4271_v16   ;;  %v5763_v16 = vlaneseq  ;;  %v4756_v41 = vld [vmem:[%s3827_s11 + $0x1f0] sm:$0xff]  ;;  %s5648_s11 = scalar_lea.sflag [#allocation3], %s189_s22 }
  0x89   : > { %v4759_v42 = vand.u32 127, %v5763_v16  ;;  %v5867_v16 = vld [vmem:[#allocation57_spill] sm:$0xff] }
  0x8a   : > { %v5868_v6 = vpack.i.bf16 %v4325_v32, %v5867_v16  ;;  %v5871_v16 = vpack.i.bf16 %v4371_v8, %v4366_v9  ;;  %v5873_v9 = vpack.i.bf16 %v4400_v14, %v4395_v13  ;;  %v5875_v13 = vpack.i.bf16 %v4427_v18, %v4422_v29  ;;  %v5877_v18 = vld [vmem:[#allocation58_spill] sm:$0xff] }
  0x8b   : > { %446 = vperm.xlu1 %3346, %v4729_v25   ;;  %443 = vperm.xlu0 %3345, %v4732_v36   ;;  %v5878_v29 = vpack.i.bf16 %v4458_v38, %v5877_v18  ;;  %v5893_v18 = vld [vmem:[#allocation63_spill] sm:$0xff] }
  0x8f   : > { %452 = vperm.xlu1 %3346, %v4737_v27   ;;  %449 = vperm.xlu0 %3345, %v4740_v26  }
  0x93   : > { %458 = vperm.xlu1 %3346, %v4745_v21   ;;  %455 = vperm.xlu0 %3345, %v4748_v33  }
  0x96   : > { %v282_v46 = vpop.permute.xlu1 %281  ;;  %v276_v47 = vpop.permute.xlu0 %275 }
  0x97   : > { %464 = vperm.xlu1 %3346, %v4753_v40   ;;  %461 = vperm.xlu0 %3345, %v4756_v41   ;;  %vm468_vm0 = vcmp.eq.s32.totalorder %v4759_v42, %v282_v46  ;;  %vm466_vm9 = vcmp.eq.s32.totalorder %v4759_v42, %v276_v47  ;;  %v5869_v46 = vpack.i.bf16 %v4340_v39, %v4330_v22 }
  0x98   : > { %v2794_v59 = vsel %vm468_vm0, 1.0, %v3736_v11  ;;  %v2792_v47 = vsel %vm466_vm9, 1.0, %v3736_v11  ;;  %v5870_v22 = vpack.i.bf16 %v4356_v12, %v4351_v19  ;;  %v5872_v19 = vpack.i.bf16 %v4386_v10, %v4376_v45 }
  0x9a   : > { %v285_v52 = vpop.permute.xlu1 %284  ;;  %v279_v53 = vpop.permute.xlu0 %278 }
  0x9b   : > { %vm469_vm11 = vcmp.eq.s32.totalorder %v4759_v42, %v285_v52  ;;  %vm467_vm10 = vcmp.eq.s32.totalorder %v4759_v42, %v279_v53  ;;  %3353 = vset.pattern.permute.xlu1 %v3737_v56  ;;  %3347 = vset.pattern.permute.xlu0 %v3737_v56 }
  0x9c   : > { %v2795_v3 = vsel %vm469_vm11, 1.0, %v3736_v11  ;;  %3355 = vperm.xlu1 %3353, %v5868_v6   ;;  %3349 = vperm.xlu0 %3347, %v5869_v46   ;;  %v2793_v52 = vsel %vm467_vm10, 1.0, %v3736_v11 }
  0x9d   : > { %v659_v53 = vpack.c.bf16 %v2795_v3, %v2794_v59  ;;  %v658_v7 = vpack.c.bf16 %v2793_v52, %v2792_v47 }
  0x9e   : > { %v291_v56 = vpop.permute.xlu1 %290  ;;  %v288_v61 = vpop.permute.xlu0 %287 }
  0x9f   : > { %vm471_vm7 = vcmp.eq.s32.totalorder %v4759_v42, %v291_v56  ;;  %vm470_vm12 = vcmp.eq.s32.totalorder %v4759_v42, %v288_v61  ;;  %3229 = vmatprep.mubr.msk.bf16.mxu0 %vm714_vm4, %v658_v7 }
  0xa0   : > { %v2797_v32 = vsel %vm471_vm7, 1.0, %v3736_v11  ;;  %v2796_v6 = vsel %vm470_vm12, 1.0, %v3736_v11  ;;  %3360 = vperm.xlu1 %3353, %v5870_v22   ;;  %3230 = vmatmul.mubr.msk.bf16.vlgmr.msra.gmra.mxu0 %vm714_vm4, %v659_v53  ;;  %v5874_v53 = vpack.i.bf16 %v4417_v24, %v4405_v17  ;;  %v5876_v24 = vpack.i.bf16 %v4444_v31, %v4439_v34 }
  0xa1   : > { %v660_v39 = vpack.c.bf16 %v2797_v32, %v2796_v6  ;;  %3365 = vperm.xlu0 %3347, %v5871_v16   ;;  %v5880_v31 = vpack.i.bf16 %v4483_v28, %v4478_v49  ;;  %v5882_v28 = vpack.i.bf16 %v4514_v54, %v4509_v48  ;;  %v5884_v48 = vpack.i.bf16 %v4536_v63, %v4531_v0  ;;  %v5889_v0 = vld [vmem:[#allocation61_spill] sm:$0xff] }
  0xa2   : > { %v297_v59 = vpop.permute.xlu1 %296  ;;  %v294_v3 = vpop.permute.xlu0 %293 }
  0xa3   : > { %vm473_vm13 = vcmp.eq.s32.totalorder %v4759_v42, %v297_v59  ;;  %vm472_vm14 = vcmp.eq.s32.totalorder %v4759_v42, %v294_v3  ;;  %3233 = vmatprep.mubr.msk.bf16.mxu0 %vm714_vm4, %v660_v39  ;;  %v5879_v59 = vpack.i.bf16 %v4473_v43, %v4463_v37  ;;  %v5881_v43 = vpack.i.bf16 %v4502_v44, %v4497_v51 }
  0xa4   : > { %v2799_v61 = vsel %vm473_vm13, 1.0, %v3736_v11  ;;  %v2798_v12 = vsel %vm472_vm14, 1.0, %v3736_v11  ;;  %3370 = vperm.xlu1 %3353, %v5872_v19  }
  0xa5   : > { %v661_v7 = vpack.c.bf16 %v2799_v61, %v2798_v12  ;;  %3375 = vperm.xlu0 %3347, %v5873_v9  }
  0xa6   : > { %v303_v8 = vpop.permute.xlu1 %302  ;;  %v300_v46 = vpop.permute.xlu0 %299 }
  0xa7   : > { %vm475_vm2 = vcmp.eq.s32.totalorder %v4759_v42, %v303_v8  ;;  %vm474_vm8 = vcmp.eq.s32.totalorder %v4759_v42, %v300_v46  ;;  %v5883_v8 = vpack.i.bf16 %v4526_v23, %v4519_v58  ;;  %v5885_v58 = vld [vmem:[#allocation60_spill] sm:$0xff] }
  0xa8   : > { %v2801_v47 = vsel %vm475_vm2, 1.0, %v3736_v11  ;;  %v2800_v52 = vsel %vm474_vm8, 1.0, %v3736_v11  ;;  %3380 = vperm.xlu1 %3353, %v5874_v53   ;;  %3234 = vmatmul.mubr.msk.bf16.gmra.mxu0 %vm714_vm4, %v661_v7 }
  0xa9   : > { %v662_v45 = vpack.c.bf16 %v2801_v47, %v2800_v52  ;;  %3385 = vperm.xlu0 %3347, %v5875_v13   ;;  %v5886_v47 = vld [vmem:[#allocation59_spill] sm:$0xff] }
  0xaa   : > { %v309_v14 = vpop.permute.xlu1 %308  ;;  %v306_v10 = vpop.permute.xlu0 %305  ;;  %v5887_v52 = vpack.i.bf16 %v5885_v58, %v5886_v47  ;;  %v5909_v58 = vld [vmem:[#allocation73_spill] sm:$0xff] }
  0xab   : > { %vm477_vm3 = vcmp.eq.s32.totalorder %v4759_v42, %v309_v14  ;;  %vm476_vm5 = vcmp.eq.s32.totalorder %v4759_v42, %v306_v10  ;;  %3237 = vmatprep.mubr.msk.bf16.mxu0 %vm714_vm4, %v662_v45  ;;  %v5888_v45 = vld [vmem:[#allocation62_spill] sm:$0xff] }
  0xac   : > { %v2803_v56 = vsel %vm477_vm3, 1.0, %v3736_v11  ;;  %v2802_v17 = vsel %vm476_vm5, 1.0, %v3736_v11  ;;  %3390 = vperm.xlu1 %3353, %v5876_v24   ;;  %v5890_v63 = vpack.i.bf16 %v5888_v45, %v5889_v0  ;;  %vm1222_vm5 = vcmp.eq.s32.totalorder %v4729_v25, 2 }
  0xad   : > { %v663_v32 = vpack.c.bf16 %v2803_v56, %v2802_v17  ;;  %3395 = vperm.xlu0 %3347, %v5878_v29   ;;  %v5891_v17 = vpack.i.bf16 %v4576_v50, %v4569_v20  ;;  %v5895_v20 = vld [vmem:[#allocation66_spill] sm:$0xff] }
  0xae   : > { %v315_v6 = vpop.permute.xlu1 %314  ;;  %v312_v22 = vpop.permute.xlu0 %311 }
  0xaf   : > { %vm479_vm6 = vcmp.eq.s32.totalorder %v4759_v42, %v315_v6  ;;  %vm478_vm1 = vcmp.eq.s32.totalorder %v4759_v42, %v312_v22 }
  0xb0   : > { %v2805_v39 = vsel %vm479_vm6, 1.0, %v3736_v11  ;;  %v2804_v16 = vsel %vm478_vm1, 1.0, %v3736_v11  ;;  %3400 = vperm.xlu1 %3353, %v5879_v59   ;;  %3238 = vmatmul.mubr.msk.bf16.gmra.mxu0 %vm714_vm4, %v663_v32  ;;  %v5892_v32 = vld [vmem:[#allocation64_spill] sm:$0xff]  ;;  %vm1221_vm6 = vcmp.eq.s32.totalorder %v4732_v36, 2  ;;  %vm1224_vm1 = vcmp.eq.s32.totalorder %v4737_v27, 2 }
  0xb1   : > { %v664_v34 = vpack.c.bf16 %v2805_v39, %v2804_v16  ;;  %3405 = vperm.xlu0 %3347, %v5880_v31   ;;  %v5894_v29 = vpack.i.bf16 %v5892_v32, %v5893_v18  ;;  %v5896_v16 = vld [vmem:[#allocation65_spill] sm:$0xff]  ;;  %v5898_v31 = vld [vmem:[#allocation68_spill] sm:$0xff] }
  0xb2   : > { %v321_v38 = vpop.permute.xlu1 %320  ;;  %v318_v3 = vpop.permute.xlu0 %317  ;;  %v5897_v59 = vpack.i.bf16 %v5895_v20, %v5896_v16 }
  0xb3   : > { %vm481_vm15 = vcmp.eq.s32.totalorder %v4759_v42, %v321_v38  ;;  %vm480_vm0 = vcmp.eq.s32.totalorder %v4759_v42, %v318_v3  ;;  %3241 = vmatprep.mubr.msk.bf16.mxu0 %vm714_vm4, %v664_v34  ;;  %v5899_v38 = vld [vmem:[#allocation67_spill] sm:$0xff] }
  0xb4   : > { %v2807_v61 = vsel %vm481_vm15, 1.0, %v3736_v11  ;;  %v2806_v37 = vsel %vm480_vm0, 1.0, %v3736_v11  ;;  %3410 = vperm.xlu1 %3353, %v5881_v43   ;;  %v5900_v3 = vpack.i.bf16 %v5898_v31, %v5899_v38  ;;  %vm1223_vm15 = vcmp.eq.s32.totalorder %v4740_v26, 2 }
  0xb5   : > { %v665_v12 = vpack.c.bf16 %v2807_v61, %v2806_v37  ;;  %3415 = vperm.xlu0 %3347, %v5882_v28   ;;  %v5901_v28 = vpack.i.bf16 %v4626_v57, %v4617_v62 }
  0xb6   : > { %v327_v49 = vpop.permute.xlu1 %326  ;;  %v324_v19 = vpop.permute.xlu0 %323 }
  0xb7   : > { %vm483_vm9 = vcmp.eq.s32.totalorder %v4759_v42, %v327_v49  ;;  %vm482_vm11 = vcmp.eq.s32.totalorder %v4759_v42, %v324_v19  ;;  %v5902_v19 = vld [vmem:[#allocation70_spill] sm:$0xff] }
  0xb8   : > { %v2809_v7 = vsel %vm483_vm9, 1.0, %v3736_v11  ;;  %v2808_v9 = vsel %vm482_vm11, 1.0, %v3736_v11  ;;  %3420 = vperm.xlu1 %3353, %v5883_v8   ;;  %3242 = vmatmul.mubr.msk.bf16.gmra.mxu0 %vm714_vm4, %v665_v12  ;;  %vm1226_vm11 = vcmp.eq.s32.totalorder %v4745_v21, 2 }
  0xb9   : > { %v666_v44 = vpack.c.bf16 %v2809_v7, %v2808_v9  ;;  %3425 = vperm.xlu0 %3347, %v5884_v48   ;;  %v5903_v7 = vld [vmem:[#allocation69_spill] sm:$0xff]  ;;  %v5905_v48 = vld [vmem:[#allocation72_spill] sm:$0xff] }
  0xba   : > { %v333_v54 = vpop.permute.xlu1 %332  ;;  %v330_v51 = vpop.permute.xlu0 %329  ;;  %v5904_v9 = vpack.i.bf16 %v5902_v19, %v5903_v7 }
  0xbb   : > { %vm485_vm10 = vcmp.eq.s32.totalorder %v4759_v42, %v333_v54  ;;  %vm484_vm7 = vcmp.eq.s32.totalorder %v4759_v42, %v330_v51  ;;  %3245 = vmatprep.mubr.msk.bf16.mxu0 %vm714_vm4, %v666_v44  ;;  %v5906_v54 = vld [vmem:[#allocation71_spill] sm:$0xff] }
  0xbc   : > { %v2811_v46 = vsel %vm485_vm10, 1.0, %v3736_v11  ;;  %v2810_v23 = vsel %vm484_vm7, 1.0, %v3736_v11  ;;  %3430 = vperm.xlu1 %3353, %v5887_v52   ;;  %v5907_v51 = vpack.i.bf16 %v5905_v48, %v5906_v54  ;;  %v2948_v52 = vsel %vm1221_vm6, 1.0, %v3736_v11 }
  0xbd   : > { %v667_v53 = vpack.c.bf16 %v2811_v46, %v2810_v23  ;;  %3435 = vperm.xlu0 %3347, %v5890_v63   ;;  %v5908_v23 = vld [vmem:[#allocation74_spill] sm:$0xff]  ;;  %vm1225_vm10 = vcmp.eq.s32.totalorder %v4748_v33, 2  ;;  %v2950_v63 = vsel %vm1223_vm15, 1.0, %v3736_v11  ;;  %vm1228_vm7 = vcmp.eq.s32.totalorder %v4753_v40, 2 }
  0xbe   : > { %v339_v13 = vpop.permute.xlu1 %338  ;;  %v336_v14 = vpop.permute.xlu0 %335  ;;  %v5910_v47 = vpack.i.bf16 %v5908_v23, %v5909_v58  ;;  %v2952_v18 = vsel %vm1225_vm10, 1.0, %v3736_v11  ;;  %v5921_v23 = vld [vmem:[#allocation10_spill] sm:$0xff] }
  0xbf   : > { %vm487_vm12 = vcmp.eq.s32.totalorder %v4759_v42, %v339_v13  ;;  %vm486_vm13 = vcmp.eq.s32.totalorder %v4759_v42, %v336_v14  ;;  %v2951_v13 = vsel %vm1224_vm1, 1.0, %v3736_v11 }
  0xc0   : > { %v2813_v10 = vsel %vm487_vm12, 1.0, %v3736_v11  ;;  %v2812_v56 = vsel %vm486_vm13, 1.0, %v3736_v11  ;;  %3440 = vperm.xlu1 %3353, %v5891_v17   ;;  %3246 = vmatmul.mubr.msk.bf16.gmra.mxu0 %vm714_vm4, %v667_v53  ;;  %v2949_v53 = vsel %vm1222_vm5, 1.0, %v3736_v11  ;;  %vm1227_vm12 = vcmp.eq.s32.totalorder %v4756_v41, 2 }
  0xc1   : > { %v668_v24 = vpack.c.bf16 %v2813_v10, %v2812_v56  ;;  %3445 = vperm.xlu0 %3347, %v5894_v29   ;;  %v3489_v56 = vpack.i.bf16 %v2949_v53, %v2948_v52  ;;  %v3494_v32 = vpack.i.bf16 %v2951_v13, %v2950_v63  ;;  %v2953_v29 = vsel %vm1226_vm11, 1.0, %v3736_v11  ;;  %v5923_v52 = vld [vmem:[#allocation11_spill] sm:$0xff]  ;;  %v5924_v53 = vld [vmem:[#allocation12_spill] sm:$0xff] }
  0xc2   : > { %v345_v6 = vpop.permute.xlu1 %344  ;;  %v342_v22 = vpop.permute.xlu0 %341  ;;  %v2954_v15 = vsel %vm1227_vm12, 1.0, %v3736_v11 }
  0xc3   : > { %vm489_vm14 = vcmp.eq.s32.totalorder %v4759_v42, %v345_v6  ;;  %vm488_vm2 = vcmp.eq.s32.totalorder %v4759_v42, %v342_v22  ;;  %3249 = vmatprep.mubr.msk.bf16.mxu0 %vm714_vm4, %v668_v24  ;;  %v5911_v24 = vpack.i.bf16 %v4684_v60, %v4679_v1  ;;  %v3499_v22 = vpack.i.bf16 %v2953_v29, %v2952_v18  ;;  %v5930_v18 = vld [vmem:[#allocation16_spill] sm:$0xff] }
  0xc4   : > { %v2815_v39 = vsel %vm489_vm14, 1.0, %v3736_v11  ;;  %v2814_v50 = vsel %vm488_vm2, 1.0, %v3736_v11  ;;  %3450 = vperm.xlu1 %3353, %v5897_v59  }
  0xc5   : > { %v669_v34 = vpack.c.bf16 %v2815_v39, %v2814_v50  ;;  %3455 = vperm.xlu0 %3347, %v5900_v3  }
  0xc6   : > { %v351_v61 = vpop.permute.xlu1 %350  ;;  %v348_v37 = vpop.permute.xlu0 %347 }
  0xc7   : > { %vm491_vm8 = vcmp.eq.s32.totalorder %v4759_v42, %v351_v61  ;;  %vm490_vm3 = vcmp.eq.s32.totalorder %v4759_v42, %v348_v37 }
  0xc8   : > { %v2817_v43 = vsel %vm491_vm8, 1.0, %v3736_v11  ;;  %v2816_v12 = vsel %vm490_vm3, 1.0, %v3736_v11  ;;  %3460 = vperm.xlu1 %3353, %v5901_v28   ;;  %3250 = vmatmul.mubr.msk.bf16.gmra.mxu0 %vm714_vm4, %v669_v34  ;;  %v5913_v28 = vpack.i.bf16 %v4710_v4, %v4707_v30  ;;  %v5918_v30 = vld [vmem:[#allocation8_spill] sm:$0xff] }
  0xc9   : > { %v670_v49 = vpack.c.bf16 %v2817_v43, %v2816_v12  ;;  %3465 = vperm.xlu0 %3347, %v5904_v9   ;;  %v5912_v43 = vpack.i.bf16 %v4700_v5, %v4697_v35  ;;  %v5915_v35 = vld [vmem:[#allocation6_spill] sm:$0xff] }
  0xca   : > { %v357_v8 = vpop.permute.xlu1 %356  ;;  %v354_v44 = vpop.permute.xlu0 %353 }
  0xcb   : > { %vm493_vm0 = vcmp.eq.s32.totalorder %v4759_v42, %v357_v8  ;;  %vm492_vm9 = vcmp.eq.s32.totalorder %v4759_v42, %v354_v44  ;;  %3253 = vmatprep.mubr.msk.bf16.mxu0 %vm714_vm4, %v670_v49  ;;  %v5914_v8 = vld [vmem:[#allocation5_spill] sm:$0xff] }
  0xcc   : > { %v2819_v57 = vsel %vm493_vm0, 1.0, %v3736_v11  ;;  %v2818_v62 = vsel %vm492_vm9, 1.0, %v3736_v11  ;;  %3470 = vperm.xlu1 %3353, %v5907_v51   ;;  %v5916_v5 = vpack.i.bf16 %v5914_v8, %v5915_v35  ;;  %v5944_v35 = vld [vmem:[#allocation25_spill] sm:$0xff] }
  0xcd   : > { %v671_v46 = vpack.c.bf16 %v2819_v57, %v2818_v62  ;;  %3475 = vperm.xlu0 %3347, %v5910_v47   ;;  %v5917_v57 = vld [vmem:[#allocation7_spill] sm:$0xff] }
  0xce   : > { %v363_v45 = vpop.permute.xlu1 %362  ;;  %v360_v0 = vpop.permute.xlu0 %359  ;;  %v5919_v4 = vpack.i.bf16 %v5917_v57, %v5918_v30  ;;  %v5947_v30 = vld [vmem:[#allocation27_spill] sm:$0xff] }
  0xcf   : > { %vm495_vm13 = vcmp.eq.s32.totalorder %v4759_v42, %v363_v45  ;;  %vm494_vm14 = vcmp.eq.s32.totalorder %v4759_v42, %v360_v0  ;;  %v5925_v45 = vpack.i.bf16 %v5923_v52, %v5924_v53  ;;  %v5953_v53 = vld [vmem:[#allocation31_spill] sm:$0xff] }
  0xd0   : > { %v2821_v14 = vsel %vm495_vm13, 1.0, %v3736_v11  ;;  %v2820_v10 = vsel %vm494_vm14, 1.0, %v3736_v11  ;;  %3480 = vperm.xlu1 %3353, %v3479_v2   ;;  %3254 = vmatmul.mubr.msk.bf16.gmra.mxu0 %vm714_vm4, %v671_v46  ;;  %v2955_v2 = vsel %vm1228_vm7, 1.0, %v3736_v11  ;;  %v5920_v46 = vld [vmem:[#allocation9_spill] sm:$0xff] }
  0xd1   : > { %v672_v17 = vpack.c.bf16 %v2821_v14, %v2820_v10  ;;  %3485 = vperm.xlu0 %3347, %v5911_v24   ;;  %v3504_v50 = vpack.i.bf16 %v2955_v2, %v2954_v15  ;;  %v5922_v58 = vpack.i.bf16 %v5920_v46, %v5921_v23  ;;  %v5926_v10 = vld [vmem:[#allocation13_spill] sm:$0xff] }
  0xd2   : > { %v369_v6 = vpop.permute.xlu1 %368  ;;  %v366_v55 = vpop.permute.xlu0 %365  ;;  %v5950_v23 = vld [vmem:[#allocation29_spill] sm:$0xff] }
  0xd3   : > { %vm497_vm2 = vcmp.eq.s32.totalorder %v4759_v42, %v369_v6  ;;  %vm496_vm8 = vcmp.eq.s32.totalorder %v4759_v42, %v366_v55  ;;  %3257 = vmatprep.mubr.msk.bf16.mxu0 %vm714_vm4, %v672_v17 }
  0xd4   : > { %v2823_v60 = vsel %vm497_vm2, 1.0, %v3736_v11  ;;  %v2822_v1 = vsel %vm496_vm8, 1.0, %v3736_v11  ;;  %3490 = vperm.xlu1 %3353, %v3489_v56   ;;  %v5927_v56 = vld [vmem:[#allocation14_spill] sm:$0xff] }
  0xd5   : > { %v673_v39 = vpack.c.bf16 %v2823_v60, %v2822_v1  ;;  %3495 = vperm.xlu0 %3347, %v3494_v32   ;;  %v5928_v17 = vpack.i.bf16 %v5926_v10, %v5927_v56  ;;  %v5929_v32 = vld [vmem:[#allocation15_spill] sm:$0xff]  ;;  %v5932_v60 = vld [vmem:[#allocation17_spill] sm:$0xff]  ;;  %v5933_v1 = vld [vmem:[#allocation18_spill] sm:$0xff] }
  0xd6   : > { %v375_v20 = vpop.permute.xlu1 %374  ;;  %v372_v16 = vpop.permute.xlu0 %371  ;;  %v5931_v29 = vpack.i.bf16 %v5929_v32, %v5930_v18  ;;  %v5956_v56 = vld [vmem:[#allocation33_spill] sm:$0xff]  ;;  %v5959_v18 = vld [vmem:[#allocation35_spill] sm:$0xff] }
  0xd7   : > { %vm499_vm3 = vcmp.eq.s32.totalorder %v4759_v42, %v375_v20  ;;  %vm498_vm5 = vcmp.eq.s32.totalorder %v4759_v42, %v372_v16  ;;  %v5936_v20 = vld [vmem:[#allocation20_spill] sm:$0xff] }
  0xd8   : > { %v2825_v59 = vsel %vm499_vm3, 1.0, %v3736_v11  ;;  %v2824_v34 = vsel %vm498_vm5, 1.0, %v3736_v11  ;;  %3500 = vperm.xlu1 %3353, %v3499_v22   ;;  %3258 = vmatmul.mubr.msk.bf16.gmra.mxu0 %vm714_vm4, %v673_v39  ;;  %v5934_v22 = vpack.i.bf16 %v5932_v60, %v5933_v1  ;;  %v5962_v1 = vld [vmem:[#allocation37_spill] sm:$0xff] }
  0xd9   : > { %3505 = vperm.xlu0 %3347, %v3504_v50   ;;  %v674_v31 = vpack.c.bf16 %v2825_v59, %v2824_v34  ;;  %v5935_v50 = vld [vmem:[#allocation19_spill] sm:$0xff] }
  0xda   : > { %v381_v38 = vpop.permute.xlu1 %380  ;;  %v378_v3 = vpop.permute.xlu0 %377  ;;  %v5937_v16 = vpack.i.bf16 %v5935_v50, %v5936_v20  ;;  %v5965_v20 = vld [vmem:[#allocation39_spill] sm:$0xff] }
  0xdb   : > { %vm501_vm6 = vcmp.eq.s32.totalorder %v4759_v42, %v381_v38  ;;  %vm500_vm1 = vcmp.eq.s32.totalorder %v4759_v42, %v378_v3  ;;  %3261 = vmatprep.mubr.msk.bf16.mxu1 %vm714_vm4, %v674_v31  ;;  %v5938_v3 = vld [vmem:[#allocation21_spill] sm:$0xff] }
  0xdc   : > { %v2827_v61 = vsel %vm501_vm6, 1.0, %v3736_v11  ;;  %v2826_v37 = vsel %vm500_vm1, 1.0, %v3736_v11  ;;  %3510 = vperm.xlu1 %3353, %v5912_v43  }
  0xdd   : > { %v675_v12 = vpack.c.bf16 %v2827_v61, %v2826_v37  ;;  %3515 = vperm.xlu0 %3347, %v5913_v28   ;;  %v5939_v61 = vld [vmem:[#allocation22_spill] sm:$0xff]  ;;  %v5942_v28 = vld [vmem:[#allocation24_spill] sm:$0xff] }
  0xde   : > { %v387_v49 = vpop.permute.xlu1 %386  ;;  %v384_v19 = vpop.permute.xlu0 %383  ;;  %v5940_v37 = vpack.i.bf16 %v5938_v3, %v5939_v61  ;;  %v5968_v61 = vld [vmem:[#allocation41_spill] sm:$0xff] }
  0xdf   : > { %vm503_vm15 = vcmp.eq.s32.totalorder %v4759_v42, %v387_v49  ;;  %vm502_vm0 = vcmp.eq.s32.totalorder %v4759_v42, %v384_v19  ;;  %3262 = vmatmul.mubr.msk.bf16.vlgmr.msra.gmra.mxu1 %vm714_vm4, %v675_v12  ;;  %v5941_v12 = vld [vmem:[#allocation23_spill] sm:$0xff] }
  0xe0   : > { %v2829_v7 = vsel %vm503_vm15, 1.0, %v3736_v11  ;;  %v2828_v9 = vsel %vm502_vm0, 1.0, %v3736_v11  ;;  %3520 = vperm.xlu1 %3353, %v5916_v5   ;;  %v5943_v49 = vpack.i.bf16 %v5941_v12, %v5942_v28  ;;  %v5945_v5 = vld [vmem:[#allocation26_spill] sm:$0xff]  ;;  %v5971_v28 = vld [vmem:[#allocation43_spill] sm:$0xff] }
  0xe1   : > { %v676_v44 = vpack.c.bf16 %v2829_v7, %v2828_v9  ;;  %3525 = vperm.xlu0 %3347, %v5919_v4   ;;  %v5948_v4 = vld [vmem:[#allocation28_spill] sm:$0xff] }
  0xe2   : > { %v393_v62 = vpop.permute.xlu1 %392  ;;  %v390_v48 = vpop.permute.xlu0 %389 }
  0xe3   : > { %vm505_vm9 = vcmp.eq.s32.totalorder %v4759_v42, %v393_v62  ;;  %vm504_vm11 = vcmp.eq.s32.totalorder %v4759_v42, %v390_v48  ;;  %3265 = vmatprep.mubr.msk.bf16.mxu1 %vm714_vm4, %v676_v44  ;;  %v5946_v44 = vpack.i.bf16 %v5944_v35, %v5945_v5  ;;  %v5949_v62 = vpack.i.bf16 %v5947_v30, %v5948_v4  ;;  %v5974_v5 = vld [vmem:[#allocation45_spill] sm:$0xff]  ;;  %v5977_v4 = vld [vmem:[#allocation47_spill] sm:$0xff] }
  0xe4   : > { %v2831_v54 = vsel %vm505_vm9, 1.0, %v3736_v11  ;;  %v2830_v51 = vsel %vm504_vm11, 1.0, %v3736_v11  ;;  %3530 = vperm.xlu1 %3353, %v5922_v58   ;;  %v5951_v58 = vld [vmem:[#allocation30_spill] sm:$0xff] }
  0xe5   : > { %v677_v47 = vpack.c.bf16 %v2831_v54, %v2830_v51  ;;  %3535 = vperm.xlu0 %3347, %v5925_v45   ;;  %v5954_v45 = vld [vmem:[#allocation32_spill] sm:$0xff] }
  0xe6   : > { %v399_v0 = vpop.permute.xlu1 %398  ;;  %v396_v63 = vpop.permute.xlu0 %395 }
  0xe7   : > { %vm507_vm10 = vcmp.eq.s32.totalorder %v4759_v42, %v399_v0  ;;  %vm506_vm7 = vcmp.eq.s32.totalorder %v4759_v42, %v396_v63  ;;  %3266 = vmatmul.mubr.msk.bf16.gmra.mxu1 %vm714_vm4, %v677_v47  ;;  %v5952_v47 = vpack.i.bf16 %v5950_v23, %v5951_v58  ;;  %v5955_v0 = vpack.i.bf16 %v5953_v53, %v5954_v45  ;;  %v5980_v58 = vld [vmem:[#allocation49_spill] sm:$0xff]  ;;  %v5984_v53 = vld [vmem:[#allocation52_spill] sm:$0xff] }
  0xe8   : > { %v2833_v13 = vsel %vm507_vm10, 1.0, %v3736_v11  ;;  %v2832_v14 = vsel %vm506_vm7, 1.0, %v3736_v11  ;;  %3540 = vperm.xlu1 %3353, %v5928_v17   ;;  %v5957_v17 = vld [vmem:[#allocation34_spill] sm:$0xff] }
  0xe9   : > { %v678_v24 = vpack.c.bf16 %v2833_v13, %v2832_v14  ;;  %3545 = vperm.xlu0 %3347, %v5931_v29   ;;  %v5960_v29 = vld [vmem:[#allocation36_spill] sm:$0xff] }
  0xea   : > { %v405_v6 = vpop.permute.xlu1 %404  ;;  %v402_v55 = vpop.permute.xlu0 %401 }
  0xeb   : > { %vm509_vm12 = vcmp.eq.s32.totalorder %v4759_v42, %v405_v6  ;;  %vm508_vm13 = vcmp.eq.s32.totalorder %v4759_v42, %v402_v55  ;;  %3269 = vmatprep.mubr.msk.bf16.mxu1 %vm714_vm4, %v678_v24  ;;  %v5958_v24 = vpack.i.bf16 %v5956_v56, %v5957_v17  ;;  %v5961_v6 = vpack.i.bf16 %v5959_v18, %v5960_v29 }
  0xec   : > { %v2835_v15 = vsel %vm509_vm12, 1.0, %v3736_v11  ;;  %v2834_v2 = vsel %vm508_vm13, 1.0, %v3736_v11  ;;  %3550 = vperm.xlu1 %3353, %v5934_v22   ;;  %v5963_v22 = vld [vmem:[#allocation38_spill] sm:$0xff]  ;;  %vm1414_vm13 = vcmp.eq.s32.totalorder %v4729_v25, 3  ;;  %v5986_v56 = vlaneseq }
  0xed   : > { %v679_v39 = vpack.c.bf16 %v2835_v15, %v2834_v2  ;;  %3555 = vperm.xlu0 %3347, %v5937_v16   ;;  %v5966_v16 = vld [vmem:[#allocation40_spill] sm:$0xff]  ;;  %v5981_v25 = vld [vmem:[#allocation50_spill] sm:$0xff] }
  0xee   : > { %v411_v59 = vpop.permute.xlu1 %410  ;;  %v408_v34 = vpop.permute.xlu0 %407  ;;  %v5114_v17 = vshrl.u32 %v5986_v56, 7 }
  0xef   : > { %vm511_vm14 = vcmp.eq.s32.totalorder %v4759_v42, %v411_v59  ;;  %vm510_vm2 = vcmp.eq.s32.totalorder %v4759_v42, %v408_v34  ;;  %3270 = vmatmul.mubr.msk.bf16.gmra.mxu1 %vm714_vm4, %v679_v39  ;;  %v5964_v39 = vpack.i.bf16 %v5962_v1, %v5963_v22  ;;  %v5967_v59 = vpack.i.bf16 %v5965_v20, %v5966_v16 }
  0xf0   : > { %v2837_v31 = vsel %vm511_vm14, 1.0, %v3736_v11  ;;  %v2836_v38 = vsel %vm510_vm2, 1.0, %v3736_v11  ;;  %3560 = vperm.xlu1 %3353, %v5940_v37   ;;  %v5969_v37 = vld [vmem:[#allocation42_spill] sm:$0xff]  ;;  %vm1413_vm14 = vcmp.eq.s32.totalorder %v4732_v36, 3  ;;  %vm1416_vm2 = vcmp.eq.s32.totalorder %v4737_v27, 3 }
  0xf1   : > { %v680_v43 = vpack.c.bf16 %v2837_v31, %v2836_v38  ;;  %3565 = vperm.xlu0 %3347, %v5943_v49   ;;  %v5972_v49 = vld [vmem:[#allocation44_spill] sm:$0xff]  ;;  %v3013_v36 = vsel %vm1414_vm13, 1.0, %v3736_v11  ;;  %v3012_v27 = vsel %vm1413_vm14, 1.0, %v3736_v11  ;;  %v1871_v20 = vsub.s32 0, %v5114_v17 }
  0xf2   : > { %v417_v19 = vpop.permute.xlu1 %416  ;;  %v414_v7 = vpop.permute.xlu0 %413 }
  0xf3   : > { %vm513_vm8 = vcmp.eq.s32.totalorder %v4759_v42, %v417_v19  ;;  %vm512_vm3 = vcmp.eq.s32.totalorder %v4759_v42, %v414_v7  ;;  %3273 = vmatprep.mubr.msk.bf16.mxu1 %vm714_vm4, %v680_v43  ;;  %v5970_v43 = vpack.i.bf16 %v5968_v61, %v5969_v37  ;;  %v5973_v19 = vpack.i.bf16 %v5971_v28, %v5972_v49 }
  0xf4   : > { %v2839_v9 = vsel %vm513_vm8, 1.0, %v3736_v11  ;;  %v2838_v8 = vsel %vm512_vm3, 1.0, %v3736_v11  ;;  %3570 = vperm.xlu1 %3353, %v5946_v44   ;;  %v5975_v44 = vld [vmem:[#allocation46_spill] sm:$0xff]  ;;  %vm1415_vm8 = vcmp.eq.s32.totalorder %v4740_v26, 3  ;;  %v5983_v26 = vld [vmem:[#allocation51_spill] sm:$0xff] }
  0xf5   : > { %v681_v57 = vpack.c.bf16 %v2839_v9, %v2838_v8  ;;  %3575 = vperm.xlu0 %3347, %v5949_v62   ;;  %v5978_v62 = vld [vmem:[#allocation48_spill] sm:$0xff]  ;;  %v5985_v45 = vpack.i.bf16 %v5983_v26, %v5984_v53 }
  0xf6   : > { %v423_v48 = vpop.permute.xlu1 %422  ;;  %v420_v54 = vpop.permute.xlu0 %419 }
  0xf7   : > { %vm515_vm5 = vcmp.eq.s32.totalorder %v4759_v42, %v423_v48  ;;  %vm514_vm6 = vcmp.eq.s32.totalorder %v4759_v42, %v420_v54  ;;  %3274 = vmatmul.mubr.msk.bf16.gmra.mxu1 %vm714_vm4, %v681_v57  ;;  %v5976_v57 = vpack.i.bf16 %v5974_v5, %v5975_v44  ;;  %v5979_v48 = vpack.i.bf16 %v5977_v4, %v5978_v62 }
  0xf8   : > { %v2841_v51 = vsel %vm515_vm5, 1.0, %v3736_v11  ;;  %v2840_v46 = vsel %vm514_vm6, 1.0, %v3736_v11  ;;  %3580 = vperm.xlu1 %3353, %v5952_v47   ;;  %v5982_v47 = vpack.i.bf16 %v5980_v58, %v5981_v25  ;;  %vm1418_vm6 = vcmp.eq.s32.totalorder %v4745_v21, 3 }
  0xf9   : > { %v682_v52 = vpack.c.bf16 %v2841_v51, %v2840_v46  ;;  %3585 = vperm.xlu0 %3347, %v5955_v0   ;;  %v3015_v0 = vsel %vm1416_vm2, 1.0, %v3736_v11 }
  0xfa   : > { %v429_v63 = vpop.permute.xlu1 %428  ;;  %v426_v13 = vpop.permute.xlu0 %425 }
  0xfb   : > { %vm517_vm1 = vcmp.eq.s32.totalorder %v4759_v42, %v429_v63  ;;  %vm516_vm15 = vcmp.eq.s32.totalorder %v4759_v42, %v426_v13  ;;  %3277 = vmatprep.mubr.msk.bf16.mxu1 %vm714_vm4, %v682_v52  ;;  %v3014_v63 = vsel %vm1415_vm8, 1.0, %v3736_v11 }
  0xfc   : > { %v2843_v14 = vsel %vm517_vm1, 1.0, %v3736_v11  ;;  %v2842_v10 = vsel %vm516_vm15, 1.0, %v3736_v11  ;;  %3590 = vperm.xlu1 %3353, %v5958_v24   ;;  %vm1417_vm1 = vcmp.eq.s32.totalorder %v4748_v33, 3  ;;  %vm1420_vm15 = vcmp.eq.s32.totalorder %v4753_v40, 3  ;;  %v5987_v24 = vld [vmem:[#allocation53_spill] sm:$0xff] }
  0xfd   : > { %v683_v32 = vpack.c.bf16 %v2843_v14, %v2842_v10  ;;  %3595 = vperm.xlu0 %3347, %v5961_v6   ;;  %v3649_v10 = vpack.i.bf16 %v3013_v36, %v3012_v27  ;;  %v3654_v40 = vpack.i.bf16 %v3015_v0, %v3014_v63  ;;  %v3016_v29 = vsel %vm1417_vm1, 1.0, %v3736_v11 }
  0xfe   : > { %v435_v55 = vpop.permute.xlu1 %434  ;;  %v432_v15 = vpop.permute.xlu0 %431 }
  0xff   : > { %vm519_vm0 = vcmp.eq.s32.totalorder %v4759_v42, %v435_v55  ;;  %vm518_vm9 = vcmp.eq.s32.totalorder %v4759_v42, %v432_v15  ;;  %3278 = vmatmul.mubr.msk.bf16.gmra.mxu1 %vm714_vm4, %v683_v32  ;;  %v5988_v32 = vld [vmem:[#allocation54_spill] sm:$0xff]  ;;  %v5990_v55 = vld [vmem:[#allocation55_spill] sm:$0xff]  ;;  %v5991_v15 = vld [vmem:[#allocation56_spill] sm:$0xff] }
 0x100   : > { %v2845_v2 = vsel %vm519_vm0, 1.0, %v3736_v11  ;;  %v2844_v60 = vsel %vm518_vm9, 1.0, %v3736_v11  ;;  %3600 = vperm.xlu1 %3353, %v5964_v39   ;;  %vm1419_vm0 = vcmp.eq.s32.totalorder %v4756_v41, 3  ;;  %v5989_v18 = vpack.i.bf16 %v5987_v24, %v5988_v32 }
 0x101   : > { %v684_v50 = vpack.c.bf16 %v2845_v2, %v2844_v60  ;;  %3605 = vperm.xlu0 %3347, %v5967_v59   ;;  %v3017_v41 = vsel %vm1418_vm6, 1.0, %v3736_v11  ;;  %v5992_v2 = vpack.i.bf16 %v5990_v55, %v5991_v15  ;;  %v3019_v60 = vsel %vm1420_vm15, 1.0, %v3736_v11 }
 0x102   : > { %v441_v34 = vpop.permute.xlu1 %440  ;;  %v438_v31 = vpop.permute.xlu0 %437  ;;  %v3018_v1 = vsel %vm1419_vm0, 1.0, %v3736_v11 }
 0x103   : > { %vm521_vm11 = vcmp.eq.s32.totalorder %v4759_v42, %v441_v34  ;;  %vm520_vm10 = vcmp.eq.s32.totalorder %v4759_v42, %v438_v31  ;;  %3281 = vmatprep.mubr.msk.bf16.mxu1 %vm714_vm4, %v684_v50  ;;  %v3659_v50 = vpack.i.bf16 %v3017_v41, %v3016_v29  ;;  %v3664_v34 = vpack.i.bf16 %v3019_v60, %v3018_v1 }
 0x104   : > { %v2847_v38 = vsel %vm521_vm11, 1.0, %v3736_v11  ;;  %v2846_v3 = vsel %vm520_vm10, 1.0, %v3736_v11  ;;  %3610 = vperm.xlu1 %3353, %v5970_v43  }
 0x105   : > { %v685_v12 = vpack.c.bf16 %v2847_v38, %v2846_v3  ;;  %3615 = vperm.xlu0 %3347, %v5973_v19   ;;  %v5137_v38 = vld [vmem:[%s5690_s2] sm:$0x3] }
 0x106   : > { %v447_v7 = vpop.permute.xlu1 %446  ;;  %v444_v9 = vpop.permute.xlu0 %443  ;;  %v5143_v61 = vrot.slane %v5137_v38, %v1871_v20 }
 0x107   : > { %vm523_vm7 = vcmp.eq.s32.totalorder %v4759_v42, %v447_v7  ;;  %vm522_vm12 = vcmp.eq.s32.totalorder %v4759_v42, %v444_v9  ;;  %3282 = vmatmul.mubr.msk.bf16.gmra.mxu1 %vm714_vm4, %v685_v12 }
 0x108   : > { %v2849_v8 = vsel %vm523_vm7, 1.0, %v3736_v11  ;;  %v2848_v35 = vsel %vm522_vm12, 1.0, %v3736_v11  ;;  %3620 = vperm.xlu1 %3353, %v5976_v57  }
 0x109   : > { %v686_v30 = vpack.c.bf16 %v2849_v8, %v2848_v35  ;;  %3625 = vperm.xlu0 %3347, %v5979_v48  }
 0x10a   : > { %v453_v54 = vpop.permute.xlu1 %452  ;;  %v450_v51 = vpop.permute.xlu0 %449 }
 0x10b   : > { %vm525_vm3 = vcmp.eq.s32.totalorder %v4759_v42, %v453_v54  ;;  %vm524_vm5 = vcmp.eq.s32.totalorder %v4759_v42, %v450_v51  ;;  %3285 = vmatprep.mubr.msk.bf16.mxu1 %vm714_vm4, %v686_v30 }
 0x10c   : > { %v2851_v46 = vsel %vm525_vm3, 1.0, %v3736_v11  ;;  %v2850_v23 = vsel %vm524_vm5, 1.0, %v3736_v11  ;;  %3630 = vperm.xlu1 %3353, %v5982_v47  }
 0x10d   : > { %v687_v52 = vpack.c.bf16 %v2851_v46, %v2850_v23  ;;  %3635 = vperm.xlu0 %3347, %v5985_v45  }
 0x10e   : > { %v459_v13 = vpop.permute.xlu1 %458  ;;  %v456_v14 = vpop.permute.xlu0 %455 }
 0x10f   : > { %vm527_vm9 = vcmp.eq.s32.totalorder %v4759_v42, %v459_v13  ;;  %vm526_vm11 = vcmp.eq.s32.totalorder %v4759_v42, %v456_v14  ;;  %3286 = vmatmul.mubr.msk.bf16.gmra.mxu1 %vm714_vm4, %v687_v52 }
 0x110   : > { %v2853_v21 = vsel %vm527_vm9, 1.0, %v3736_v11  ;;  %v2852_v33 = vsel %vm526_vm11, 1.0, %v3736_v11  ;;  %3640 = vperm.xlu1 %3353, %v5989_v18  }
 0x111   : > { %v688_v6 = vpack.c.bf16 %v2853_v21, %v2852_v33  ;;  %3645 = vperm.xlu0 %3347, %v5992_v2  }
 0x112   : > { %v465_v22 = vpop.permute.xlu1 %464  ;;  %v462_v39 = vpop.permute.xlu0 %461 }
 0x113   : > { %vm529_vm10 = vcmp.eq.s32.totalorder %v4759_v42, %v465_v22  ;;  %vm528_vm7 = vcmp.eq.s32.totalorder %v4759_v42, %v462_v39  ;;  %3289 = vmatprep.mubr.msk.bf16.mxu1 %vm714_vm4, %v688_v6 }
 0x114   : > { %v2855_v16 = vsel %vm529_vm10, 1.0, %v3736_v11  ;;  %v2854_v59 = vsel %vm528_vm7, 1.0, %v3736_v11  ;;  %3650 = vperm.xlu1 %3353, %v3649_v10  }
 0x115   : > { %v689_v31 = vpack.c.bf16 %v2855_v16, %v2854_v59  ;;  %3655 = vperm.xlu0 %3347, %v3654_v40  }
 0x117   : > { %v5139_v3 = vpop.permute.xlu1 %3355  ;;  %3290 = vmatmul.mubr.msk.bf16.gmra.mxu1 %vm714_vm4, %v689_v31  ;;  %v3350_v42 = vpop.permute.xlu0 %3349 }
 0x118   : > { %v3358_v37 = vunpack.i.h.bf16 %v5139_v3  ;;  %v3352_v11 = vunpack.i.h.bf16 %v3350_v42  ;;  %v3351_v43 = vunpack.i.l.bf16 %v3350_v42  ;;  %3660 = vperm.xlu1 %3353, %v3659_v50  }
 0x119   : > { %3665 = vperm.xlu0 %3347, %v3664_v34  }
 0x11a   : > { %v5147_v12 = vmul.f32 %v3358_v37, %v5143_v61  ;;  %v5150_v28 = vmul.f32 %v3352_v11, %v5143_v61  ;;  %v5153_v49 = vmul.f32 %v3351_v43, %v5143_v61 }
 0x11b   : > { %v3361_v19 = vpop.permute.xlu1 %3360 }
 0x11c   : > { %v3363_v7 = vunpack.i.h.bf16 %v3361_v19  ;;  %v3362_v9 = vunpack.i.l.bf16 %v3361_v19  ;;  %v3366_v8 = vpop.permute.xlu0 %3365 }
 0x11d   : > { %v3368_v35 = vunpack.i.h.bf16 %v3366_v8  ;;  %v3367_v5 = vunpack.i.l.bf16 %v3366_v8 }
 0x11e   : > { %v5156_v44 = vmul.f32 %v3363_v7, %v5143_v61  ;;  %v5159_v57 = vmul.f32 %v3362_v9, %v5143_v61 }
 0x11f   : > { %v5162_v30 = vmul.f32 %v3368_v35, %v5143_v61  ;;  %v5165_v4 = vmul.f32 %v3367_v5, %v5143_v61  ;;  %v3371_v62 = vpop.permute.xlu1 %3370 }
 0x120   : > { %v3373_v48 = vunpack.i.h.bf16 %v3371_v62  ;;  %v3372_v54 = vunpack.i.l.bf16 %v3371_v62  ;;  %v3376_v51 = vpop.permute.xlu0 %3375 }
 0x121   : > { %v3378_v46 = vunpack.i.h.bf16 %v3376_v51  ;;  %v3377_v23 = vunpack.i.l.bf16 %v3376_v51 }
 0x122   : > { %v5168_v58 = vmul.f32 %v3373_v48, %v5143_v61  ;;  %v5171_v25 = vmul.f32 %v3372_v54, %v5143_v61 }
 0x123   : > { %v5174_v47 = vmul.f32 %v3378_v46, %v5143_v61  ;;  %v5177_v36 = vmul.f32 %v3377_v23, %v5143_v61  ;;  %v3381_v27 = vpop.permute.xlu1 %3380 }
 0x124   : > { %v3383_v52 = vunpack.i.h.bf16 %v3381_v27  ;;  %v3382_v26 = vunpack.i.l.bf16 %v3381_v27  ;;  %v3386_v53 = vpop.permute.xlu0 %3385 }
 0x125   : > { %v3388_v45 = vunpack.i.h.bf16 %v3386_v53  ;;  %v3387_v0 = vunpack.i.l.bf16 %v3386_v53 }
 0x126   : > { %v5180_v63 = vmul.f32 %v3383_v52, %v5143_v61  ;;  %v5183_v13 = vmul.f32 %v3382_v26, %v5143_v61 }
 0x127   : > { %v5186_v14 = vmul.f32 %v3388_v45, %v5143_v61  ;;  %v5189_v10 = vmul.f32 %v3387_v0, %v5143_v61  ;;  %v3391_v56 = vpop.permute.xlu1 %3390 }
 0x128   : > { %v3393_v21 = vunpack.i.h.bf16 %v3391_v56  ;;  %v3392_v33 = vunpack.i.l.bf16 %v3391_v56  ;;  %v3396_v24 = vpop.permute.xlu0 %3395 }
 0x129   : > { %v3398_v32 = vunpack.i.h.bf16 %v3396_v24  ;;  %v3397_v18 = vunpack.i.l.bf16 %v3396_v24 }
 0x12a   : > { %v5192_v40 = vmul.f32 %v3393_v21, %v5143_v61  ;;  %v5195_v41 = vmul.f32 %v3392_v33, %v5143_v61 }
 0x12b   : > { %v5198_v29 = vmul.f32 %v3398_v32, %v5143_v61  ;;  %v5201_v6 = vmul.f32 %v3397_v18, %v5143_v61  ;;  %v3401_v55 = vpop.permute.xlu1 %3400 }
 0x12c   : > { %v3403_v15 = vunpack.i.h.bf16 %v3401_v55  ;;  %v3402_v2 = vunpack.i.l.bf16 %v3401_v55  ;;  %v3406_v60 = vpop.permute.xlu0 %3405 }
 0x12d   : > { %v3408_v1 = vunpack.i.h.bf16 %v3406_v60  ;;  %v3407_v22 = vunpack.i.l.bf16 %v3406_v60 }
 0x12e   : > { %v5204_v39 = vmul.f32 %v3403_v15, %v5143_v61  ;;  %v5207_v50 = vmul.f32 %v3402_v2, %v5143_v61 }
 0x12f   : > { %v5210_v20 = vmul.f32 %v3408_v1, %v5143_v61  ;;  %v5213_v16 = vmul.f32 %v3407_v22, %v5143_v61  ;;  %v3411_v59 = vpop.permute.xlu1 %3410 }
 0x130   : > { %v3413_v34 = vunpack.i.h.bf16 %v3411_v59  ;;  %v3412_v31 = vunpack.i.l.bf16 %v3411_v59  ;;  %v3416_v42 = vpop.permute.xlu0 %3415 }
 0x131   : > { %v3418_v37 = vunpack.i.h.bf16 %v3416_v42  ;;  %v3417_v11 = vunpack.i.l.bf16 %v3416_v42 }
 0x132   : > { %v5216_v43 = vmul.f32 %v3413_v34, %v5143_v61  ;;  %v5219_v19 = vmul.f32 %v3412_v31, %v5143_v61 }
 0x133   : > { %v5222_v7 = vmul.f32 %v3418_v37, %v5143_v61  ;;  %v5225_v9 = vmul.f32 %v3417_v11, %v5143_v61  ;;  %v3421_v8 = vpop.permute.xlu1 %3420 }
 0x134   : > { %v3423_v35 = vunpack.i.h.bf16 %v3421_v8  ;;  %v3422_v5 = vunpack.i.l.bf16 %v3421_v8  ;;  %v3426_v62 = vpop.permute.xlu0 %3425 }
 0x135   : > { %v3428_v48 = vunpack.i.h.bf16 %v3426_v62  ;;  %v3427_v54 = vunpack.i.l.bf16 %v3426_v62 }
 0x136   : > { %v5228_v51 = vmul.f32 %v3422_v5, %v5143_v61  ;;  %v5231_v46 = vmul.f32 %v3423_v35, %v5143_v61 }
 0x137   : > { %v5234_v23 = vmul.f32 %v3428_v48, %v5143_v61  ;;  %v5237_v27 = vmul.f32 %v3427_v54, %v5143_v61  ;;  %v3431_v52 = vpop.permute.xlu1 %3430 }
 0x138   : > { %v3433_v26 = vunpack.i.h.bf16 %v3431_v52  ;;  %v3432_v53 = vunpack.i.l.bf16 %v3431_v52  ;;  %v3436_v45 = vpop.permute.xlu0 %3435 }
 0x139   : > { %v3438_v0 = vunpack.i.h.bf16 %v3436_v45  ;;  %v3437_v56 = vunpack.i.l.bf16 %v3436_v45 }
 0x13a   : > { %v5240_v21 = vmul.f32 %v3433_v26, %v5143_v61  ;;  %v5243_v33 = vmul.f32 %v3432_v53, %v5143_v61 }
 0x13b   : > { %v5246_v24 = vmul.f32 %v3438_v0, %v5143_v61  ;;  %v5249_v32 = vmul.f32 %v3437_v56, %v5143_v61  ;;  %v3441_v18 = vpop.permute.xlu1 %3440 }
 0x13c   : > { %v3443_v55 = vunpack.i.h.bf16 %v3441_v18  ;;  %v3442_v15 = vunpack.i.l.bf16 %v3441_v18  ;;  %v3446_v2 = vpop.permute.xlu0 %3445 }
 0x13d   : > { %v3448_v60 = vunpack.i.h.bf16 %v3446_v2  ;;  %v3447_v1 = vunpack.i.l.bf16 %v3446_v2 }
 0x13e   : > { %v5252_v22 = vmul.f32 %v3443_v55, %v5143_v61  ;;  %v5255_v59 = vmul.f32 %v3442_v15, %v5143_v61 }
 0x13f   : > { %v5258_v34 = vmul.f32 %v3448_v60, %v5143_v61  ;;  %v5261_v31 = vmul.f32 %v3447_v1, %v5143_v61  ;;  %v3451_v42 = vpop.permute.xlu1 %3450 }
 0x140   : > { %5993 = vst [vmem:[#allocation57_spill] sm:$0xff] %v5252_v22  ;;  %v3453_v37 = vunpack.i.h.bf16 %v3451_v42  ;;  %v3452_v11 = vunpack.i.l.bf16 %v3451_v42  ;;  %v3456_v8 = vpop.permute.xlu0 %3455 }
 0x141   : > { %5994 = vst [vmem:[#allocation58_spill] sm:$0xff] %v5258_v34  ;;  %v3458_v35 = vunpack.i.h.bf16 %v3456_v8  ;;  %v3457_v5 = vunpack.i.l.bf16 %v3456_v8 }
 0x142   : > { %v5264_v62 = vmul.f32 %v3453_v37, %v5143_v61  ;;  %v5267_v48 = vmul.f32 %v3452_v11, %v5143_v61 }
 0x143   : > { %v5270_v54 = vmul.f32 %v3458_v35, %v5143_v61  ;;  %v5273_v52 = vmul.f32 %v3457_v5, %v5143_v61  ;;  %v3461_v26 = vpop.permute.xlu1 %3460 }
 0x144   : > { %5995 = vst [vmem:[#allocation60_spill] sm:$0xff] %v5264_v62  ;;  %5996 = vst [vmem:[#allocation59_spill] sm:$0xff] %v5267_v48  ;;  %v3463_v53 = vunpack.i.h.bf16 %v3461_v26  ;;  %v3462_v45 = vunpack.i.l.bf16 %v3461_v26  ;;  %v3466_v0 = vpop.permute.xlu0 %3465 }
 0x145   : > { %5997 = vst [vmem:[#allocation62_spill] sm:$0xff] %v5270_v54  ;;  %5998 = vst [vmem:[#allocation61_spill] sm:$0xff] %v5273_v52  ;;  %v3468_v56 = vunpack.i.h.bf16 %v3466_v0  ;;  %v3467_v18 = vunpack.i.l.bf16 %v3466_v0 }
 0x146   : > { %v5276_v55 = vmul.f32 %v3463_v53, %v5143_v61  ;;  %v5279_v15 = vmul.f32 %v3462_v45, %v5143_v61 }
 0x147   : > { %v5282_v2 = vmul.f32 %v3468_v56, %v5143_v61  ;;  %v5285_v60 = vmul.f32 %v3467_v18, %v5143_v61  ;;  %v3471_v1 = vpop.permute.xlu1 %3470 }
 0x148   : > { %5999 = vst [vmem:[#allocation64_spill] sm:$0xff] %v5276_v55  ;;  %6000 = vst [vmem:[#allocation63_spill] sm:$0xff] %v5279_v15  ;;  %v3473_v42 = vunpack.i.h.bf16 %v3471_v1  ;;  %v3472_v37 = vunpack.i.l.bf16 %v3471_v1  ;;  %v3476_v11 = vpop.permute.xlu0 %3475 }
 0x149   : > { %6001 = vst [vmem:[#allocation66_spill] sm:$0xff] %v5282_v2  ;;  %6002 = vst [vmem:[#allocation65_spill] sm:$0xff] %v5285_v60  ;;  %v3478_v8 = vunpack.i.h.bf16 %v3476_v11  ;;  %v3477_v35 = vunpack.i.l.bf16 %v3476_v11 }
 0x14a   : > { %v5288_v5 = vmul.f32 %v3473_v42, %v5143_v61  ;;  %v5291_v26 = vmul.f32 %v3472_v37, %v5143_v61 }
 0x14b   : > { %v5294_v53 = vmul.f32 %v3478_v8, %v5143_v61  ;;  %v5297_v45 = vmul.f32 %v3477_v35, %v5143_v61  ;;  %v3481_v0 = vpop.permute.xlu1 %3480 }
 0x14c   : > { %6003 = vst [vmem:[#allocation68_spill] sm:$0xff] %v5288_v5  ;;  %6004 = vst [vmem:[#allocation67_spill] sm:$0xff] %v5291_v26  ;;  %v3483_v56 = vunpack.i.h.bf16 %v3481_v0  ;;  %v3482_v18 = vunpack.i.l.bf16 %v3481_v0  ;;  %v3486_v55 = vpop.permute.xlu0 %3485 }
 0x14d   : > { %6005 = vst [vmem:[#allocation70_spill] sm:$0xff] %v5294_v53  ;;  %6006 = vst [vmem:[#allocation69_spill] sm:$0xff] %v5297_v45  ;;  %v3488_v1 = vunpack.i.h.bf16 %v3486_v55  ;;  %v3487_v2 = vunpack.i.l.bf16 %v3486_v55 }
 0x14e   : > { %v5300_v11 = vmul.f32 %v3483_v56, %v5143_v61  ;;  %v5303_v42 = vmul.f32 %v3482_v18, %v5143_v61 }
 0x14f   : > { %v5306_v37 = vmul.f32 %v3488_v1, %v5143_v61  ;;  %v5309_v8 = vmul.f32 %v3487_v2, %v5143_v61  ;;  %v3491_v35 = vpop.permute.xlu1 %3490 }
 0x150   : > { %6007 = vst [vmem:[#allocation72_spill] sm:$0xff] %v5300_v11  ;;  %6008 = vst [vmem:[#allocation71_spill] sm:$0xff] %v5303_v42  ;;  %v3493_v5 = vunpack.i.h.bf16 %v3491_v35  ;;  %v3492_v53 = vunpack.i.l.bf16 %v3491_v35  ;;  %v3496_v26 = vpop.permute.xlu0 %3495 }
 0x151   : > { %6009 = vst [vmem:[#allocation74_spill] sm:$0xff] %v5306_v37  ;;  %6010 = vst [vmem:[#allocation73_spill] sm:$0xff] %v5309_v8  ;;  %v3498_v0 = vunpack.i.h.bf16 %v3496_v26  ;;  %v3497_v45 = vunpack.i.l.bf16 %v3496_v26 }
 0x152   : > { %v5312_v55 = vmul.f32 %v3493_v5, %v5143_v61  ;;  %v5315_v56 = vmul.f32 %v3492_v53, %v5143_v61 }
 0x153   : > { %v5318_v18 = vmul.f32 %v3498_v0, %v5143_v61  ;;  %v5321_v1 = vmul.f32 %v3497_v45, %v5143_v61  ;;  %v3501_v2 = vpop.permute.xlu1 %3500  ;;  %v2323_v45 = vsub.s32 1, %v5114_v17 }
 0x154   : > { %6011 = vst [vmem:[#allocation5_spill] sm:$0xff] %v5312_v55  ;;  %6012 = vst [vmem:[#allocation6_spill] sm:$0xff] %v5315_v56  ;;  %v3503_v11 = vunpack.i.h.bf16 %v3501_v2  ;;  %v3502_v37 = vunpack.i.l.bf16 %v3501_v2  ;;  %v3506_v35 = vpop.permute.xlu0 %3505  ;;  %v3357_v2 = vunpack.i.l.bf16 %v5139_v3 }
 0x155   : > { %6013 = vst [vmem:[#allocation7_spill] sm:$0xff] %v5318_v18  ;;  %6014 = vst [vmem:[#allocation8_spill] sm:$0xff] %v5321_v1  ;;  %v3508_v42 = vunpack.i.h.bf16 %v3506_v35  ;;  %v3507_v8 = vunpack.i.l.bf16 %v3506_v35  ;;  %v5338_v35 = vrot.slane %v5137_v38, %v2323_v45  ;;  %v3027_v38 = vld [vmem:[%s5691_s3] sm:$0xff]  }
 0x156   : > { %v5324_v26 = vmul.f32 %v3502_v37, %v5143_v61  ;;  %v5327_v5 = vmul.f32 %v3503_v11, %v5143_v61  ;;  %v1875_v11 = vmul.f32 %v3357_v2, %v5143_v61  ;;  %v3028_v60 = vunpack.c.l.bf16 %v3027_v38 }
 0x157   : > { %v5330_v53 = vmul.f32 %v3508_v42, %v5143_v61  ;;  %v5333_v0 = vmul.f32 %v3507_v8, %v5143_v61  ;;  %v3154_v8 = vld [vmem:[%s5691_s3 + $0x8] sm:$0xff]  }
 0x158   : > { %6015 = vst [vmem:[#allocation9_spill] sm:$0xff] %v5324_v26  ;;  %6016 = vst [vmem:[#allocation10_spill] sm:$0xff] %v5327_v5  ;;  %v3516_v55 = vpop.permute.xlu0 %3515  ;;  %v3511_v26 = vpop.permute.xlu1 %3510  ;;  %v3032_v45 = vunpack.c.l.bf16 %v3154_v8 }
 0x159   : > { %6017 = vst [vmem:[#allocation11_spill] sm:$0xff] %v5330_v53  ;;  %6018 = vst [vmem:[#allocation12_spill] sm:$0xff] %v5333_v0  ;;  %v3517_v37 = vunpack.i.l.bf16 %v3516_v55  ;;  %v3512_v5 = vunpack.i.l.bf16 %v3511_v26  ;;  %v3518_v18 = vunpack.i.h.bf16 %v3516_v55 }
 0x15b   : > { %v2327_v17 = vmul.f32 %v3517_v37, %v5338_v35  ;;  %v2325_v3 = vmul.f32 %v3512_v5, %v5338_v35  ;;  %v3513_v37 = vunpack.i.h.bf16 %v3511_v26  ;;  %v2328_v5 = vmul.f32 %v3518_v18, %v5338_v35  ;;  %v3155_v26 = vld [vmem:[%s5691_s3 + $0x10] sm:$0xff]  }
 0x15c   : > { %v3521_v34 = vpop.permute.xlu1 %3520 }
 0x15d   : > { %v2326_v18 = vmul.f32 %v3513_v37, %v5338_v35 }
 0x160   : > { %v3231_v42 = vpop.f32.mrf.mxu0 }
 0x161   : > { %v1102_v53 = vmul.f32 11.313708, %v3231_v42  ;;  %v3526_v42 = vpop.permute.xlu0 %3525 }
 0x162   : > { %v845_v0 = vpop.f32.mrf.mxu0  ;;  %v3527_v48 = vunpack.i.l.bf16 %v3526_v42 }
 0x163   : > { %v1939_v61 = vadd.f32 %v1875_v11, %v1102_v53  ;;  %v1100_v2 = vmul.f32 11.313708, %v845_v0  ;;  %v3033_v11 = vunpack.c.h.bf16 %v3154_v8 }
 0x164   : > { %v3232_v56 = vpop.f32.mrf.mxu0  ;;  %v2331_v8 = vmul.f32 %v3527_v48, %v5338_v35 }
 0x165   : > { %v2391_v1 = vadd.f32 %v2327_v17, %v1939_v61  ;;  %v1937_v15 = vadd.f32 %v5153_v49, %v1100_v2  ;;  %v1103_v62 = vmul.f32 11.313708, %v3232_v56  ;;  %v3156_v49 = vld [vmem:[%s5691_s3 + $0x18] sm:$0xff]   ;;  %v3522_v17 = vunpack.i.l.bf16 %v3521_v34 }
 0x166   : > { %v848_v54 = vpop.f32.mrf.mxu0 }
 0x167   : > { %v2583_v52 = vadd.f32 %v3032_v45, %v2391_v1  ;;  %v2389_v22 = vadd.f32 %v2325_v3, %v1937_v15  ;;  %v1940_v53 = vadd.f32 %v5147_v12, %v1103_v62  ;;  %v1101_v0 = vmul.f32 11.313708, %v848_v54 }
 0x168   : > { %v3235_v55 = vpop.f32.mrf.mxu0  ;;  %v3029_v62 = vunpack.c.h.bf16 %v3027_v38 }
 0x169   : > { %2647 = vst [vmem:[%s5358_s7 + $0x10] sm:$0xff] %v2583_v52  ;;  %v2581_v56 = vadd.f32 %v3028_v60, %v2389_v22  ;;  %v1106_v15 = vmul.f32 11.313708, %v3235_v55  ;;  %v2392_v1 = vadd.f32 %v2328_v5, %v1940_v53  ;;  %v1938_v12 = vadd.f32 %v5150_v28, %v1101_v0  ;;  %v3536_v0 = vpop.permute.xlu0 %3535 }
 0x16a   : > { %v861_v54 = vpop.f32.mrf.mxu0  ;;  %v3040_v52 = vunpack.c.l.bf16 %v3156_v49  ;;  %v3528_v60 = vunpack.i.h.bf16 %v3526_v42  ;;  %v2329_v28 = vmul.f32 %v3522_v17, %v5338_v35  ;;  %v3036_v5 = vunpack.c.l.bf16 %v3155_v26 }
 0x16b   : > { %2645 = vst [vmem:[%s5358_s7] sm:$0xff] %v2581_v56  ;;  %v1943_v3 = vadd.f32 %v5165_v4, %v1106_v15  ;;  %v1104_v22 = vmul.f32 11.313708, %v861_v54  ;;  %v2584_v61 = vadd.f32 %v3033_v11, %v2392_v1  ;;  %v2390_v45 = vadd.f32 %v2326_v18, %v1938_v12  ;;  %v3531_v18 = vpop.permute.xlu1 %3530 }
 0x16c   : > { %v3236_v2 = vpop.f32.mrf.mxu0  ;;  %v3523_v53 = vunpack.i.h.bf16 %v3521_v34  ;;  %v3537_v56 = vunpack.i.l.bf16 %v3536_v0  ;;  %v2332_v11 = vmul.f32 %v3528_v60, %v5338_v35  ;;  %v3041_v1 = vunpack.c.h.bf16 %v3156_v49  ;;  %v3158_v34 = vld [vmem:[%s5691_s3 + $0x28] sm:$0xff]  }
 0x16d   : > { %v2395_v38 = vadd.f32 %v2331_v8, %v1943_v3  ;;  %v1941_v37 = vadd.f32 %v5159_v57, %v1104_v22  ;;  %2648 = vst [vmem:[%s5358_s7 + $0x18] sm:$0xff] %v2584_v61  ;;  %v2582_v48 = vadd.f32 %v3029_v62, %v2390_v45  ;;  %v1107_v55 = vmul.f32 11.313708, %v3236_v2 }
 0x16e   : > { %v864_v4 = vpop.f32.mrf.mxu0  ;;  %v3532_v62 = vunpack.i.l.bf16 %v3531_v18  ;;  %v2330_v3 = vmul.f32 %v3523_v53, %v5338_v35  ;;  %v3037_v60 = vunpack.c.h.bf16 %v3155_v26  ;;  %v2335_v49 = vmul.f32 %v3537_v56, %v5338_v35 }
 0x16f   : > { %v2587_v15 = vadd.f32 %v3040_v52, %v2395_v38  ;;  %v2393_v42 = vadd.f32 %v2329_v28, %v1941_v37  ;;  %2646 = vst [vmem:[%s5358_s7 + $0x8] sm:$0xff] %v2582_v48  ;;  %v1944_v17 = vadd.f32 %v5162_v30, %v1107_v55  ;;  %v1105_v57 = vmul.f32 11.313708, %v864_v4  ;;  %v3157_v30 = vld [vmem:[%s5691_s3 + $0x20] sm:$0xff]   ;;  %v3546_v37 = vpop.permute.xlu0 %3545  ;;  %v3541_v56 = vpop.permute.xlu1 %3540 }
 0x170   : > { %v3239_v12 = vpop.f32.mrf.mxu0  ;;  %v3048_v2 = vunpack.c.l.bf16 %v3158_v34  ;;  %v3538_v38 = vunpack.i.h.bf16 %v3536_v0  ;;  %v2333_v26 = vmul.f32 %v3532_v62, %v5338_v35  ;;  %v3044_v4 = vunpack.c.l.bf16 %v3157_v30 }
 0x171   : > { %2651 = vst [vmem:[%s5358_s7 + $0x30] sm:$0xff] %v2587_v15  ;;  %v2585_v54 = vadd.f32 %v3036_v5, %v2393_v42  ;;  %v1110_v8 = vmul.f32 11.313708, %v3239_v12  ;;  %v2396_v52 = vadd.f32 %v2332_v11, %v1944_v17  ;;  %v1942_v22 = vadd.f32 %v5156_v44, %v1105_v57 }
 0x172   : > { %v877_v61 = vpop.f32.mrf.mxu0  ;;  %v3533_v15 = vunpack.i.h.bf16 %v3531_v18  ;;  %v3547_v17 = vunpack.i.l.bf16 %v3546_v37  ;;  %v3049_v62 = vunpack.c.h.bf16 %v3158_v34  ;;  %v3160_v18 = vld [vmem:[%s5691_s3 + $0x38] sm:$0xff]  }
 0x173   : > { %2649 = vst [vmem:[%s5358_s7 + $0x20] sm:$0xff] %v2585_v54  ;;  %v1947_v45 = vadd.f32 %v5177_v36, %v1110_v8  ;;  %v1108_v28 = vmul.f32 11.313708, %v877_v61  ;;  %v2588_v5 = vadd.f32 %v3041_v1, %v2396_v52  ;;  %v2394_v53 = vadd.f32 %v2330_v3, %v1942_v22 }
 0x174   : > { %v3240_v44 = vpop.f32.mrf.mxu0  ;;  %v2336_v1 = vmul.f32 %v3538_v38, %v5338_v35  ;;  %v3542_v8 = vunpack.i.l.bf16 %v3541_v56  ;;  %v2334_v22 = vmul.f32 %v3533_v15, %v5338_v35  ;;  %v2339_v34 = vmul.f32 %v3547_v17, %v5338_v35 }
 0x175   : > { %v2399_v48 = vadd.f32 %v2335_v49, %v1947_v45  ;;  %v1945_v55 = vadd.f32 %v5171_v25, %v1108_v28  ;;  %2652 = vst [vmem:[%s5358_s7 + $0x38] sm:$0xff] %v2588_v5  ;;  %v2586_v42 = vadd.f32 %v3037_v60, %v2394_v53  ;;  %v1111_v36 = vmul.f32 11.313708, %v3240_v44  ;;  %v3556_v53 = vpop.permute.xlu0 %3555 }
 0x176   : > { %v880_v11 = vpop.f32.mrf.mxu0  ;;  %v3045_v49 = vunpack.c.h.bf16 %v3157_v30  ;;  %v3056_v28 = vunpack.c.l.bf16 %v3160_v18  ;;  %v3548_v5 = vunpack.i.h.bf16 %v3546_v37  ;;  %v2337_v30 = vmul.f32 %v3542_v8, %v5338_v35 }
 0x177   : > { %v2591_v0 = vadd.f32 %v3048_v2, %v2399_v48  ;;  %v2397_v57 = vadd.f32 %v2333_v26, %v1945_v55  ;;  %2650 = vst [vmem:[%s5358_s7 + $0x28] sm:$0xff] %v2586_v42  ;;  %v1948_v12 = vadd.f32 %v5174_v47, %v1111_v36  ;;  %v1109_v54 = vmul.f32 11.313708, %v880_v11  ;;  %v3159_v47 = vld [vmem:[%s5691_s3 + $0x30] sm:$0xff]   ;;  %v3551_v42 = vpop.permute.xlu1 %3550 }
 0x178   : > { %v3243_v25 = vpop.f32.mrf.mxu0  ;;  %v3543_v15 = vunpack.i.h.bf16 %v3541_v56  ;;  %v3557_v17 = vunpack.i.l.bf16 %v3556_v53  ;;  %v3162_v56 = vld [vmem:[%s5691_s3 + $0x48] sm:$0xff]  }
 0x179   : > { %2655 = vst [vmem:[%s5358_s7 + $0x50] sm:$0xff] %v2591_v0  ;;  %v2589_v3 = vadd.f32 %v3044_v4, %v2397_v57  ;;  %v1114_v52 = vmul.f32 11.313708, %v3243_v25  ;;  %v2400_v60 = vadd.f32 %v2336_v1, %v1948_v12  ;;  %v1946_v61 = vadd.f32 %v5168_v58, %v1109_v54 }
 0x17a   : > { %v893_v45 = vpop.f32.mrf.mxu0  ;;  %v3052_v4 = vunpack.c.l.bf16 %v3159_v47  ;;  %v2340_v57 = vmul.f32 %v3548_v5, %v5338_v35  ;;  %v3057_v12 = vunpack.c.h.bf16 %v3160_v18  ;;  %v3552_v54 = vunpack.i.l.bf16 %v3551_v42 }
 0x17b   : > { %2653 = vst [vmem:[%s5358_s7 + $0x40] sm:$0xff] %v2589_v3  ;;  %v1951_v2 = vadd.f32 %v5189_v10, %v1114_v52  ;;  %v1112_v38 = vmul.f32 11.313708, %v893_v45  ;;  %v2592_v44 = vadd.f32 %v3049_v62, %v2400_v60  ;;  %v2398_v26 = vadd.f32 %v2334_v22, %v1946_v61 }
 0x17c   : > { %v3244_v58 = vpop.f32.mrf.mxu0  ;;  %v2338_v3 = vmul.f32 %v3543_v15, %v5338_v35  ;;  %v3053_v60 = vunpack.c.h.bf16 %v3159_v47  ;;  %v2343_v18 = vmul.f32 %v3557_v17, %v5338_v35  ;;  %v3064_v45 = vunpack.c.l.bf16 %v3162_v56 }
 0x17d   : > { %v2403_v48 = vadd.f32 %v2339_v34, %v1951_v2  ;;  %v1949_v55 = vadd.f32 %v5183_v13, %v1112_v38  ;;  %2656 = vst [vmem:[%s5358_s7 + $0x58] sm:$0xff] %v2592_v44  ;;  %v2590_v36 = vadd.f32 %v3045_v49, %v2398_v26  ;;  %v1115_v10 = vmul.f32 11.313708, %v3244_v58 }
 0x17e   : > { %v896_v11 = vpop.f32.mrf.mxu0  ;;  %v3558_v2 = vunpack.i.h.bf16 %v3556_v53  ;;  %v2341_v47 = vmul.f32 %v3552_v54, %v5338_v35  ;;  %v3065_v17 = vunpack.c.h.bf16 %v3162_v56 }
 0x17f   : > { %v2595_v37 = vadd.f32 %v3056_v28, %v2403_v48  ;;  %v2401_v0 = vadd.f32 %v2337_v30, %v1949_v55  ;;  %2654 = vst [vmem:[%s5358_s7 + $0x48] sm:$0xff] %v2590_v36  ;;  %v1952_v1 = vadd.f32 %v5186_v14, %v1115_v10  ;;  %v1113_v62 = vmul.f32 11.313708, %v896_v11  ;;  %v3161_v14 = vld [vmem:[%s5691_s3 + $0x40] sm:$0xff]   ;;  %v3566_v28 = vpop.permute.xlu0 %3565  ;;  %v3561_v48 = vpop.permute.xlu1 %3560 }
 0x180   : > { %v3247_v13 = vpop.f32.mrf.mxu0  ;;  %v3060_v58 = vunpack.c.l.bf16 %v3161_v14  ;;  %v3553_v30 = vunpack.i.h.bf16 %v3551_v42  ;;  %v3567_v15 = vunpack.i.l.bf16 %v3566_v28  ;;  %v2344_v10 = vmul.f32 %v3558_v2, %v5338_v35  ;;  %v3164_v42 = vld [vmem:[%s5691_s3 + $0x58] sm:$0xff]  }
 0x181   : > { %2659 = vst [vmem:[%s5358_s7 + $0x70] sm:$0xff] %v2595_v37  ;;  %v2593_v25 = vadd.f32 %v3052_v4, %v2401_v0  ;;  %v1118_v8 = vmul.f32 11.313708, %v3247_v13  ;;  %v2404_v52 = vadd.f32 %v2340_v57, %v1952_v1  ;;  %v1950_v22 = vadd.f32 %v5180_v63, %v1113_v62 }
 0x182   : > { %v909_v61 = vpop.f32.mrf.mxu0  ;;  %v3562_v0 = vunpack.i.l.bf16 %v3561_v48  ;;  %v3061_v54 = vunpack.c.h.bf16 %v3161_v14  ;;  %v2347_v56 = vmul.f32 %v3567_v15, %v5338_v35  ;;  %v3563_v2 = vunpack.i.h.bf16 %v3561_v48  ;;  %v3166_v48 = vld [vmem:[%s5691_s3 + $0x68] sm:$0xff]  }
 0x183   : > { %2657 = vst [vmem:[%s5358_s7 + $0x60] sm:$0xff] %v2593_v25  ;;  %v1955_v49 = vadd.f32 %v5201_v6, %v1118_v8  ;;  %v1116_v34 = vmul.f32 11.313708, %v909_v61  ;;  %v2596_v38 = vadd.f32 %v3057_v12, %v2404_v52  ;;  %v2402_v5 = vadd.f32 %v2338_v3, %v1950_v22 }
 0x184   : > { %v3248_v63 = vpop.f32.mrf.mxu0  ;;  %v2342_v12 = vmul.f32 %v3553_v30, %v5338_v35  ;;  %v3072_v3 = vunpack.c.l.bf16 %v3164_v42  ;;  %v3568_v22 = vunpack.i.h.bf16 %v3566_v28  ;;  %v2345_v14 = vmul.f32 %v3562_v0, %v5338_v35 }
 0x185   : > { %v2407_v44 = vadd.f32 %v2343_v18, %v1955_v49  ;;  %v1953_v26 = vadd.f32 %v5195_v41, %v1116_v34  ;;  %2660 = vst [vmem:[%s5358_s7 + $0x78] sm:$0xff] %v2596_v38  ;;  %v2594_v55 = vadd.f32 %v3053_v60, %v2402_v5  ;;  %v1119_v6 = vmul.f32 11.313708, %v3248_v63  ;;  %v3576_v60 = vpop.permute.xlu0 %3575  ;;  %v3571_v38 = vpop.permute.xlu1 %3570 }
 0x186   : > { %v912_v4 = vpop.f32.mrf.mxu0  ;;  %v3073_v30 = vunpack.c.h.bf16 %v3164_v42  ;;  %v3080_v42 = vunpack.c.l.bf16 %v3166_v48 }
 0x187   : > { %v2599_v53 = vadd.f32 %v3064_v45, %v2407_v44  ;;  %v2405_v36 = vadd.f32 %v2341_v47, %v1953_v26  ;;  %2658 = vst [vmem:[%s5358_s7 + $0x68] sm:$0xff] %v2594_v55  ;;  %v1956_v11 = vadd.f32 %v5198_v29, %v1119_v6  ;;  %v1117_v37 = vmul.f32 11.313708, %v912_v4  ;;  %v3163_v29 = vld [vmem:[%s5691_s3 + $0x50] sm:$0xff]  }
 0x188   : > { %v3251_v41 = vpop.f32.mrf.mxu0  ;;  %v3068_v34 = vunpack.c.l.bf16 %v3163_v29  ;;  %v3577_v47 = vunpack.i.l.bf16 %v3576_v60  ;;  %v2348_v26 = vmul.f32 %v3568_v22, %v5338_v35  ;;  %v3572_v6 = vunpack.i.l.bf16 %v3571_v38 }
 0x189   : > { %2663 = vst [vmem:[%s5358_s7 + $0x90] sm:$0xff] %v2599_v53  ;;  %v2597_v57 = vadd.f32 %v3060_v58, %v2405_v36  ;;  %v1122_v1 = vmul.f32 11.313708, %v3251_v41  ;;  %v2408_v62 = vadd.f32 %v2344_v10, %v1956_v11  ;;  %v1954_v13 = vadd.f32 %v5192_v40, %v1117_v37 }
 0x18a   : > { %v925_v25 = vpop.f32.mrf.mxu0  ;;  %v2346_v53 = vmul.f32 %v3563_v2, %v5338_v35  ;;  %v3069_v11 = vunpack.c.h.bf16 %v3163_v29  ;;  %v2351_v37 = vmul.f32 %v3577_v47, %v5338_v35 }
 0x18b   : > { %2661 = vst [vmem:[%s5358_s7 + $0x80] sm:$0xff] %v2597_v57  ;;  %v1959_v8 = vadd.f32 %v5213_v16, %v1122_v1  ;;  %v1120_v52 = vmul.f32 11.313708, %v925_v25  ;;  %v2600_v61 = vadd.f32 %v3065_v17, %v2408_v62  ;;  %v2406_v18 = vadd.f32 %v2342_v12, %v1954_v13  ;;  %v3586_v1 = vpop.permute.xlu0 %3585 }
 0x18c   : > { %v3252_v40 = vpop.f32.mrf.mxu0  ;;  %v3578_v57 = vunpack.i.h.bf16 %v3576_v60  ;;  %v2349_v13 = vmul.f32 %v3572_v6, %v5338_v35  ;;  %v3587_v22 = vunpack.i.l.bf16 %v3586_v1 }
 0x18d   : > { %v2411_v49 = vadd.f32 %v2347_v56, %v1959_v8  ;;  %v1957_v45 = vadd.f32 %v5207_v50, %v1120_v52  ;;  %2664 = vst [vmem:[%s5358_s7 + $0x98] sm:$0xff] %v2600_v61  ;;  %v2598_v5 = vadd.f32 %v3061_v54, %v2406_v18  ;;  %v1123_v16 = vmul.f32 11.313708, %v3252_v40  ;;  %v3581_v8 = vpop.permute.xlu1 %3580 }
 0x18e   : > { %v928_v63 = vpop.f32.mrf.mxu0  ;;  %v3573_v56 = vunpack.i.h.bf16 %v3571_v38  ;;  %v2352_v18 = vmul.f32 %v3578_v57, %v5338_v35 }
 0x18f   : > { %v2603_v28 = vadd.f32 %v3072_v3, %v2411_v49  ;;  %v2409_v44 = vadd.f32 %v2345_v14, %v1957_v45  ;;  %2662 = vst [vmem:[%s5358_s7 + $0x88] sm:$0xff] %v2598_v5  ;;  %v1960_v58 = vadd.f32 %v5210_v20, %v1123_v16  ;;  %v1121_v55 = vmul.f32 11.313708, %v928_v63  ;;  %v3165_v20 = vld [vmem:[%s5691_s3 + $0x60] sm:$0xff]   ;;  %v3168_v45 = vld [vmem:[%s5691_s3 + $0x78] sm:$0xff]   ;;  %v5472_v16 = vld [vmem:[%s5691_s3 + $0x70] sm:$0xff]  }
 0x190   : > { %v3255_v50 = vpop.f32.mrf.mxu0  ;;  %v3076_v29 = vunpack.c.l.bf16 %v3165_v20  ;;  %v3081_v14 = vunpack.c.h.bf16 %v3166_v48  ;;  %v3077_v38 = vunpack.c.h.bf16 %v3165_v20  ;;  %v3588_v63 = vunpack.i.h.bf16 %v3586_v1 }
 0x191   : > { %2667 = vst [vmem:[%s5358_s7 + $0xb0] sm:$0xff] %v2603_v28  ;;  %v2601_v4 = vadd.f32 %v3068_v34, %v2409_v44  ;;  %v1126_v15 = vmul.f32 11.313708, %v3255_v50  ;;  %v2412_v36 = vadd.f32 %v2348_v26, %v1960_v58  ;;  %v1958_v10 = vadd.f32 %v5204_v39, %v1121_v55  ;;  %v3596_v58 = vpop.permute.xlu0 %3595 }
 0x192   : > { %v941_v17 = vpop.f32.mrf.mxu0  ;;  %v3582_v34 = vunpack.i.l.bf16 %v3581_v8  ;;  %v2355_v26 = vmul.f32 %v3587_v22, %v5338_v35  ;;  %v3088_v55 = vunpack.c.l.bf16 %v3168_v45  ;;  %v3583_v48 = vunpack.i.h.bf16 %v3581_v8 }
 0x193   : > { %2665 = vst [vmem:[%s5358_s7 + $0xa0] sm:$0xff] %v2601_v4  ;;  %v1963_v41 = vadd.f32 %v5225_v9, %v1126_v15  ;;  %v1124_v0 = vmul.f32 11.313708, %v941_v17  ;;  %v2604_v12 = vadd.f32 %v3073_v30, %v2412_v36  ;;  %v2410_v62 = vadd.f32 %v2346_v53, %v1958_v10  ;;  %v3591_v10 = vpop.permute.xlu1 %3590 }
 0x194   : > { %v3256_v39 = vpop.f32.mrf.mxu0  ;;  %v3084_v15 = vunpack.c.l.bf16 %v5472_v16  ;;  %v2353_v36 = vmul.f32 %v3582_v34, %v5338_v35  ;;  %v2356_v20 = vmul.f32 %v3588_v63, %v5338_v35 }
 0x195   : > { %v2415_v54 = vadd.f32 %v2351_v37, %v1963_v41  ;;  %v1961_v25 = vadd.f32 %v5219_v19, %v1124_v0  ;;  %2668 = vst [vmem:[%s5358_s7 + $0xb8] sm:$0xff] %v2604_v12  ;;  %v2602_v3 = vadd.f32 %v3069_v11, %v2410_v62  ;;  %v1127_v9 = vmul.f32 11.313708, %v3256_v39  ;;  %v3606_v22 = vpop.permute.xlu0 %3605 }
 0x196   : > { %v944_v52 = vpop.f32.mrf.mxu0  ;;  %v3597_v37 = vunpack.i.l.bf16 %v3596_v58  ;;  %v3089_v41 = vunpack.c.h.bf16 %v3168_v45  ;;  %v2354_v39 = vmul.f32 %v3583_v48, %v5338_v35 }
 0x197   : > { %v2607_v60 = vadd.f32 %v3080_v42, %v2415_v54  ;;  %v2413_v61 = vadd.f32 %v2349_v13, %v1961_v25  ;;  %2666 = vst [vmem:[%s5358_s7 + $0xa8] sm:$0xff] %v2602_v3  ;;  %v1964_v40 = vadd.f32 %v5222_v7, %v1127_v9  ;;  %v1125_v49 = vmul.f32 11.313708, %v944_v52 }
 0x198   : > { %v3259_v19 = vpop.f32.mrf.mxu0  ;;  %v2350_v7 = vmul.f32 %v3573_v56, %v5338_v35  ;;  %v3592_v13 = vunpack.i.l.bf16 %v3591_v10  ;;  %v3085_v54 = vunpack.c.h.bf16 %v5472_v16  ;;  %v3598_v56 = vunpack.i.h.bf16 %v3596_v58 }
 0x199   : > { %2671 = vst [vmem:[%s5358_s7 + $0xd0] sm:$0xff] %v2607_v60  ;;  %v2605_v2 = vadd.f32 %v3076_v29, %v2413_v61  ;;  %v1130_v5 = vmul.f32 11.313708, %v3259_v19  ;;  %v2416_v47 = vadd.f32 %v2352_v18, %v1964_v40  ;;  %v1962_v28 = vadd.f32 %v5216_v43, %v1125_v49  ;;  %v3169_v29 = vld [vmem:[%s5691_s3 + $0x80] sm:$0xff]  }
 0x19a   : > { %v957_v44 = vpop.f32.mrf.mxu0  ;;  %v2359_v52 = vmul.f32 %v3597_v37, %v5338_v35  ;;  %v3593_v40 = vunpack.i.h.bf16 %v3591_v10  ;;  %v3092_v19 = vunpack.c.l.bf16 %v3169_v29  ;;  %v2357_v34 = vmul.f32 %v3592_v13, %v5338_v35 }
 0x19b   : > { %2669 = vst [vmem:[%s5358_s7 + $0xc0] sm:$0xff] %v2605_v2  ;;  %v1967_v30 = vadd.f32 %v5237_v27, %v1130_v5  ;;  %v1128_v50 = vmul.f32 11.313708, %v957_v44  ;;  %v2608_v6 = vadd.f32 %v3081_v14, %v2416_v47  ;;  %v2414_v4 = vadd.f32 %v2350_v7, %v1962_v28  ;;  %v3601_v2 = vpop.permute.xlu1 %3600 }
 0x19c   : > { %v3260_v53 = vpop.f32.mrf.mxu0  ;;  %v2360_v16 = vmul.f32 %v3598_v56, %v5338_v35 }
 0x19d   : > { %v2419_v43 = vadd.f32 %v2355_v26, %v1967_v30  ;;  %v1965_v11 = vadd.f32 %v5228_v51, %v1128_v50  ;;  %v1131_v17 = vmul.f32 11.313708, %v3260_v53  ;;  %2672 = vst [vmem:[%s5358_s7 + $0xd8] sm:$0xff] %v2608_v6  ;;  %v2606_v27 = vadd.f32 %v3077_v38, %v2414_v4  ;;  %v3170_v51 = vld [vmem:[%s5691_s3 + $0x88] sm:$0xff]   ;;  %v3172_v30 = vld [vmem:[%s5691_s3 + $0x98] sm:$0xff]  }
 0x19e   : > { %v960_v42 = vpop.f32.mrf.mxu0  ;;  %v3096_v61 = vunpack.c.l.bf16 %v3170_v51  ;;  %v3097_v63 = vunpack.c.h.bf16 %v3170_v51  ;;  %v3093_v50 = vunpack.c.h.bf16 %v3169_v29 }
 0x19f   : > { %v2611_v0 = vadd.f32 %v3088_v55, %v2419_v43  ;;  %v2417_v57 = vadd.f32 %v2353_v36, %v1965_v11  ;;  %v1968_v1 = vadd.f32 %v5234_v23, %v1131_v17  ;;  %v1129_v12 = vmul.f32 11.313708, %v960_v42  ;;  %v3263_v62 = vpop.f32.mrf.mxu1  ;;  %2670 = vst [vmem:[%s5358_s7 + $0xc8] sm:$0xff] %v2606_v27  ;;  %v3616_v17 = vpop.permute.xlu0 %3615 }
 0x1a0   : > { %v1134_v25 = vmul.f32 11.313708, %v3263_v62  ;;  %v3602_v55 = vunpack.i.l.bf16 %v3601_v2  ;;  %v3608_v36 = vunpack.i.h.bf16 %v3606_v22  ;;  %v3104_v43 = vunpack.c.l.bf16 %v3172_v30 }
 0x1a1   : > { %2675 = vst [vmem:[%s5358_s7 + $0xf0] sm:$0xff] %v2611_v0  ;;  %v2609_v23 = vadd.f32 %v3084_v15, %v2417_v57  ;;  %v2420_v8 = vadd.f32 %v2356_v20, %v1968_v1  ;;  %v1966_v3 = vadd.f32 %v5231_v46, %v1129_v12  ;;  %v973_v9 = vpop.f32.mrf.mxu1  ;;  %v3611_v1 = vpop.permute.xlu1 %3610 }
 0x1a2   : > { %v1971_v60 = vadd.f32 %v5249_v32, %v1134_v25  ;;  %v1132_v18 = vmul.f32 11.313708, %v973_v9  ;;  %v3607_v32 = vunpack.i.l.bf16 %v3606_v22  ;;  %v2361_v42 = vmul.f32 %v3602_v55, %v5338_v35  ;;  %v3174_v9 = vld [vmem:[%s5691_s3 + $0xa8] sm:$0xff]   ;;  %v6022_v55 = vld [vmem:[#allocation59_spill] sm:$0xff] }
 0x1a3   : > { %2673 = vst [vmem:[%s5358_s7 + $0xe0] sm:$0xff] %v2609_v23  ;;  %v2612_v14 = vadd.f32 %v3089_v41, %v2420_v8  ;;  %v2418_v49 = vadd.f32 %v2354_v39, %v1966_v3  ;;  %v3264_v45 = vpop.f32.mrf.mxu1  ;;  %v2364_v13 = vmul.f32 %v3608_v36, %v5338_v35  ;;  %v3105_v25 = vunpack.c.h.bf16 %v3172_v30  ;;  %v6019_v23 = vld [vmem:[#allocation58_spill] sm:$0xff] }
 0x1a4   : > { %v2423_v38 = vadd.f32 %v2359_v52, %v1971_v60  ;;  %v1969_v46 = vadd.f32 %v5243_v33, %v1132_v18  ;;  %v1135_v5 = vmul.f32 11.313708, %v3264_v45  ;;  %v2358_v33 = vmul.f32 %v3593_v40, %v5338_v35  ;;  %v6020_v40 = vld [vmem:[#allocation57_spill] sm:$0xff] }
 0x1a5   : > { %2676 = vst [vmem:[%s5358_s7 + $0xf8] sm:$0xff] %v2612_v14  ;;  %v2610_v7 = vadd.f32 %v3085_v54, %v2418_v49  ;;  %v976_v47 = vpop.f32.mrf.mxu1  ;;  %v2363_v10 = vmul.f32 %v3607_v32, %v5338_v35  ;;  %v3617_v54 = vunpack.i.l.bf16 %v3616_v17  ;;  %v3612_v52 = vunpack.i.l.bf16 %v3611_v1  ;;  %v6021_v32 = vld [vmem:[#allocation61_spill] sm:$0xff] }
 0x1a6   : > { %v2615_v28 = vadd.f32 %v3096_v61, %v2423_v38  ;;  %v2421_v44 = vadd.f32 %v2357_v34, %v1969_v46  ;;  %v1972_v26 = vadd.f32 %v5246_v24, %v1135_v5  ;;  %v1133_v58 = vmul.f32 11.313708, %v976_v47  ;;  %v3171_v24 = vld [vmem:[%s5691_s3 + $0x90] sm:$0xff]   ;;  %v3626_v46 = vpop.permute.xlu0 %3625 }
 0x1a7   : > { %2674 = vst [vmem:[%s5358_s7 + $0xe8] sm:$0xff] %v2610_v7  ;;  %v3267_v48 = vpop.f32.mrf.mxu1  ;;  %v3100_v0 = vunpack.c.l.bf16 %v3171_v24  ;;  %v3101_v22 = vunpack.c.h.bf16 %v3171_v24  ;;  %v3618_v45 = vunpack.i.h.bf16 %v3616_v17  ;;  %v2367_v34 = vmul.f32 %v3617_v54, %v5338_v35  ;;  %v3176_v17 = vld [vmem:[%s5691_s3 + $0xb8] sm:$0xff]  }
 0x1a8   : > { %2679 = vst [vmem:[%s5358_s7 + $0x110] sm:$0xff] %v2615_v28  ;;  %v2613_v6 = vadd.f32 %v3092_v19, %v2421_v44  ;;  %v2424_v4 = vadd.f32 %v2360_v16, %v1972_v26  ;;  %v1970_v15 = vadd.f32 %v5240_v21, %v1133_v58  ;;  %v1138_v53 = vmul.f32 11.313708, %v3267_v48  ;;  %v3173_v19 = vld [vmem:[%s5691_s3 + $0xa0] sm:$0xff]   ;;  %v3621_v58 = vpop.permute.xlu1 %3620 }
 0x1a9   : > { %v989_v11 = vpop.f32.mrf.mxu1  ;;  %v3603_v21 = vunpack.i.h.bf16 %v3601_v2  ;;  %v3112_v2 = vunpack.c.l.bf16 %v3174_v9  ;;  %v3613_v47 = vunpack.i.h.bf16 %v3611_v1  ;;  %v2365_v28 = vmul.f32 %v3612_v52, %v5338_v35 }
 0x1aa   : > { %2677 = vst [vmem:[%s5358_s7 + $0x100] sm:$0xff] %v2613_v6  ;;  %v2616_v20 = vadd.f32 %v3097_v63, %v2424_v4  ;;  %v2422_v37 = vadd.f32 %v2358_v33, %v1970_v15  ;;  %v1975_v27 = vadd.f32 %v5261_v31, %v1138_v53  ;;  %v1136_v41 = vmul.f32 11.313708, %v989_v11  ;;  %v3636_v54 = vpop.permute.xlu0 %3635 }
 0x1ab   : > { %v3268_v57 = vpop.f32.mrf.mxu1  ;;  %v3108_v44 = vunpack.c.l.bf16 %v3173_v19  ;;  %v2368_v6 = vmul.f32 %v3618_v45, %v5338_v35  ;;  %v3627_v4 = vunpack.i.l.bf16 %v3626_v46  ;;  %v3113_v15 = vunpack.c.h.bf16 %v3174_v9 }
 0x1ac   : > { %2680 = vst [vmem:[%s5358_s7 + $0x118] sm:$0xff] %v2616_v20  ;;  %v2614_v12 = vadd.f32 %v3093_v50, %v2422_v37  ;;  %v2427_v62 = vadd.f32 %v2363_v10, %v1975_v27  ;;  %v1973_v51 = vadd.f32 %v5255_v59, %v1136_v41  ;;  %v1139_v39 = vmul.f32 11.313708, %v3268_v57  ;;  %v6023_v10 = vld [vmem:[#allocation62_spill] sm:$0xff]  ;;  %v3631_v52 = vpop.permute.xlu1 %3630 }
 0x1ad   : > { %v992_v31 = vpop.f32.mrf.mxu1  ;;  %v2362_v59 = vmul.f32 %v3603_v21, %v5338_v35  ;;  %v2366_v20 = vmul.f32 %v3613_v47, %v5338_v35  ;;  %v3622_v37 = vunpack.i.l.bf16 %v3621_v58  ;;  %v3109_v27 = vunpack.c.h.bf16 %v3173_v19 }
 0x1ae   : > { %2678 = vst [vmem:[%s5358_s7 + $0x108] sm:$0xff] %v2614_v12  ;;  %v2619_v29 = vadd.f32 %v3104_v43, %v2427_v62  ;;  %v2425_v56 = vadd.f32 %v2361_v42, %v1973_v51  ;;  %v1976_v8 = vadd.f32 %v6019_v23, %v1139_v39  ;;  %v1137_v3 = vmul.f32 11.313708, %v992_v31  ;;  %v3175_v12 = vld [vmem:[%s5691_s3 + $0xb0] sm:$0xff]  }
 0x1af   : > { %v3271_v60 = vpop.f32.mrf.mxu1  ;;  %v3628_v62 = vunpack.i.h.bf16 %v3626_v46  ;;  %v2371_v51 = vmul.f32 %v3627_v4, %v5338_v35  ;;  %v3120_v39 = vunpack.c.l.bf16 %v3176_v17  ;;  %v3116_v9 = vunpack.c.l.bf16 %v3175_v12  ;;  %v3646_v4 = vpop.permute.xlu0 %3645 }
 0x1b0   : > { %2683 = vst [vmem:[%s5358_s7 + $0x130] sm:$0xff] %v2619_v29  ;;  %v2617_v61 = vadd.f32 %v3100_v0, %v2425_v56  ;;  %v2428_v18 = vadd.f32 %v2364_v13, %v1976_v8  ;;  %v1974_v14 = vadd.f32 %v6020_v40, %v1137_v3  ;;  %v1142_v49 = vmul.f32 11.313708, %v3271_v60  ;;  %v6024_v0 = vld [vmem:[#allocation60_spill] sm:$0xff]  ;;  %v6025_v29 = vld [vmem:[#allocation65_spill] sm:$0xff] }
 0x1b1   : > { %v1005_v38 = vpop.f32.mrf.mxu1  ;;  %v3623_v8 = vunpack.i.h.bf16 %v3621_v58  ;;  %v2369_v3 = vmul.f32 %v3622_v37, %v5338_v35  ;;  %v3121_v19 = vunpack.c.h.bf16 %v3176_v17  ;;  %v3641_v37 = vpop.permute.xlu1 %3640 }
 0x1b2   : > { %2681 = vst [vmem:[%s5358_s7 + $0x120] sm:$0xff] %v2617_v61  ;;  %v2620_v5 = vadd.f32 %v3105_v25, %v2428_v18  ;;  %v2426_v16 = vadd.f32 %v2362_v59, %v1974_v14  ;;  %v1979_v7 = vadd.f32 %v6021_v32, %v1142_v49  ;;  %v1140_v63 = vmul.f32 11.313708, %v1005_v38  ;;  %v6026_v61 = vld [vmem:[#allocation63_spill] sm:$0xff]  ;;  %v6027_v38 = vld [vmem:[#allocation66_spill] sm:$0xff] }
 0x1b3   : > { %v3272_v26 = vpop.f32.mrf.mxu1  ;;  %v2372_v14 = vmul.f32 %v3628_v62, %v5338_v35  ;;  %v3637_v49 = vunpack.i.l.bf16 %v3636_v54  ;;  %v2370_v32 = vmul.f32 %v3623_v8, %v5338_v35 }
 0x1b4   : > { %2684 = vst [vmem:[%s5358_s7 + $0x138] sm:$0xff] %v2620_v5  ;;  %v2618_v30 = vadd.f32 %v3101_v22, %v2426_v16  ;;  %v2431_v33 = vadd.f32 %v2367_v34, %v1979_v7  ;;  %v1977_v50 = vadd.f32 %v6022_v55, %v1140_v63  ;;  %v1143_v48 = vmul.f32 11.313708, %v3272_v26  ;;  %v3178_v16 = vld [vmem:[%s5691_s3 + $0xc8] sm:$0xff]   ;;  %v6028_v26 = vld [vmem:[#allocation64_spill] sm:$0xff] }
 0x1b5   : > { %v1008_v53 = vpop.f32.mrf.mxu1  ;;  %v3632_v7 = vunpack.i.l.bf16 %v3631_v52  ;;  %v3117_v63 = vunpack.c.h.bf16 %v3175_v12  ;;  %v3638_v55 = vunpack.i.h.bf16 %v3636_v54  ;;  %v3129_v12 = vunpack.c.h.bf16 %v3178_v16 }
 0x1b6   : > { %2682 = vst [vmem:[%s5358_s7 + $0x128] sm:$0xff] %v2618_v30  ;;  %v2623_v24 = vadd.f32 %v3112_v2, %v2431_v33  ;;  %v2429_v36 = vadd.f32 %v2365_v28, %v1977_v50  ;;  %v1980_v43 = vadd.f32 %v6023_v10, %v1143_v48  ;;  %v1141_v11 = vmul.f32 11.313708, %v1008_v53  ;;  %v3177_v33 = vld [vmem:[%s5691_s3 + $0xc0] sm:$0xff]  }
 0x1b7   : > { %v3275_v41 = vpop.f32.mrf.mxu1  ;;  %v2375_v50 = vmul.f32 %v3637_v49, %v5338_v35  ;;  %v3128_v48 = vunpack.c.l.bf16 %v3178_v16  ;;  %v3124_v17 = vunpack.c.l.bf16 %v3177_v33  ;;  %v3656_v49 = vpop.permute.xlu0 %3655 }
 0x1b8   : > { %2687 = vst [vmem:[%s5358_s7 + $0x150] sm:$0xff] %v2623_v24  ;;  %v2621_v21 = vadd.f32 %v3108_v44, %v2429_v36  ;;  %v2432_v42 = vadd.f32 %v2368_v6, %v1980_v43  ;;  %v1978_v57 = vadd.f32 %v6024_v0, %v1141_v11  ;;  %v1146_v1 = vmul.f32 11.313708, %v3275_v41  ;;  %v6029_v24 = vld [vmem:[#allocation69_spill] sm:$0xff] }
 0x1b9   : > { %v1021_v13 = vpop.f32.mrf.mxu1  ;;  %v3633_v43 = vunpack.i.h.bf16 %v3631_v52  ;;  %v2373_v11 = vmul.f32 %v3632_v7, %v5338_v35  ;;  %v3651_v7 = vpop.permute.xlu1 %3650 }
 0x1ba   : > { %2685 = vst [vmem:[%s5358_s7 + $0x140] sm:$0xff] %v2621_v21  ;;  %v2624_v25 = vadd.f32 %v3113_v15, %v2432_v42  ;;  %v2430_v31 = vadd.f32 %v2366_v20, %v1978_v57  ;;  %v1983_v56 = vadd.f32 %v6025_v29, %v1146_v1  ;;  %v1144_v23 = vmul.f32 11.313708, %v1021_v13  ;;  %v6030_v21 = vld [vmem:[#allocation67_spill] sm:$0xff]  ;;  %v6031_v13 = vld [vmem:[#allocation70_spill] sm:$0xff] }
 0x1bb   : > { %v3276_v59 = vpop.f32.mrf.mxu1  ;;  %v2376_v57 = vmul.f32 %v3638_v55, %v5338_v35  ;;  %v3647_v1 = vunpack.i.l.bf16 %v3646_v4  ;;  %v2374_v29 = vmul.f32 %v3633_v43, %v5338_v35 }
 0x1bc   : > { %2688 = vst [vmem:[%s5358_s7 + $0x158] sm:$0xff] %v2624_v25  ;;  %v2622_v22 = vadd.f32 %v3109_v27, %v2430_v31  ;;  %v2435_v60 = vadd.f32 %v2371_v51, %v1983_v56  ;;  %v1981_v18 = vadd.f32 %v6026_v61, %v1144_v23  ;;  %v1147_v40 = vmul.f32 11.313708, %v3276_v59  ;;  %v3180_v31 = vld [vmem:[%s5691_s3 + $0xd8] sm:$0xff]  }
 0x1bd   : > { %v1024_v45 = vpop.f32.mrf.mxu1  ;;  %v3642_v56 = vunpack.i.l.bf16 %v3641_v37  ;;  %v3125_v23 = vunpack.c.h.bf16 %v3177_v33  ;;  %v6032_v59 = vld [vmem:[#allocation68_spill] sm:$0xff]  ;;  %v3648_v61 = vunpack.i.h.bf16 %v3646_v4  ;;  %v3137_v33 = vunpack.c.h.bf16 %v3180_v31 }
 0x1be   : > { %2686 = vst [vmem:[%s5358_s7 + $0x148] sm:$0xff] %v2622_v22  ;;  %v2627_v34 = vadd.f32 %v3120_v39, %v2435_v60  ;;  %v2433_v2 = vadd.f32 %v2369_v3, %v1981_v18  ;;  %v1984_v46 = vadd.f32 %v6027_v38, %v1147_v40  ;;  %v1145_v5 = vmul.f32 11.313708, %v1024_v45  ;;  %v3179_v60 = vld [vmem:[%s5691_s3 + $0xd0] sm:$0xff]  }
 0x1bf   : > { %v3279_v47 = vpop.f32.mrf.mxu1  ;;  %v2379_v18 = vmul.f32 %v3647_v1, %v5338_v35  ;;  %v3136_v40 = vunpack.c.l.bf16 %v3180_v31  ;;  %v3132_v16 = vunpack.c.l.bf16 %v3179_v60  ;;  %v3666_v1 = vpop.permute.xlu0 %3665 }
 0x1c0   : > { %2691 = vst [vmem:[%s5358_s7 + $0x170] sm:$0xff] %v2627_v34  ;;  %v2625_v28 = vadd.f32 %v3116_v9, %v2433_v2  ;;  %v2436_v44 = vadd.f32 %v2372_v14, %v1984_v46  ;;  %v1982_v58 = vadd.f32 %v6028_v26, %v1145_v5  ;;  %v1150_v30 = vmul.f32 11.313708, %v3279_v47  ;;  %v6033_v34 = vld [vmem:[#allocation73_spill] sm:$0xff] }
 0x1c1   : > { %v1037_v6 = vpop.f32.mrf.mxu1  ;;  %v3643_v46 = vunpack.i.h.bf16 %v3641_v37  ;;  %v2377_v5 = vmul.f32 %v3642_v56, %v5338_v35  ;;  %v3661_v56 = vpop.permute.xlu1 %3660 }
 0x1c2   : > { %2689 = vst [vmem:[%s5358_s7 + $0x160] sm:$0xff] %v2625_v28  ;;  %v2628_v15 = vadd.f32 %v3121_v19, %v2436_v44  ;;  %v2434_v53 = vadd.f32 %v2370_v32, %v1982_v58  ;;  %v1987_v36 = vadd.f32 %v6029_v24, %v1150_v30  ;;  %v1148_v10 = vmul.f32 11.313708, %v1037_v6  ;;  %v6034_v28 = vld [vmem:[#allocation71_spill] sm:$0xff]  ;;  %v6035_v6 = vld [vmem:[#allocation74_spill] sm:$0xff] }
 0x1c3   : > { %v3280_v20 = vpop.f32.mrf.mxu1  ;;  %v2380_v58 = vmul.f32 %v3648_v61, %v5338_v35  ;;  %v3657_v30 = vunpack.i.l.bf16 %v3656_v49  ;;  %v2378_v24 = vmul.f32 %v3643_v46, %v5338_v35 }
 0x1c4   : > { %2692 = vst [vmem:[%s5358_s7 + $0x178] sm:$0xff] %v2628_v15  ;;  %v2626_v27 = vadd.f32 %v3117_v63, %v2434_v53  ;;  %v2439_v41 = vadd.f32 %v2375_v50, %v1987_v36  ;;  %v1985_v42 = vadd.f32 %v6030_v21, %v1148_v10  ;;  %v1151_v0 = vmul.f32 11.313708, %v3280_v20  ;;  %v3182_v53 = vld [vmem:[%s5691_s3 + $0xe8] sm:$0xff]   ;;  %v6036_v20 = vld [vmem:[#allocation72_spill] sm:$0xff] }
 0x1c5   : > { %v1040_v62 = vpop.f32.mrf.mxu1  ;;  %v3652_v36 = vunpack.i.l.bf16 %v3651_v7  ;;  %v3133_v10 = vunpack.c.h.bf16 %v3179_v60  ;;  %v3658_v21 = vunpack.i.h.bf16 %v3656_v49  ;;  %v3145_v60 = vunpack.c.h.bf16 %v3182_v53 }
 0x1c6   : > { %2690 = vst [vmem:[%s5358_s7 + $0x168] sm:$0xff] %v2626_v27  ;;  %v2631_v51 = vadd.f32 %v3128_v48, %v2439_v41  ;;  %v2437_v39 = vadd.f32 %v2373_v11, %v1985_v42  ;;  %v1988_v54 = vadd.f32 %v6031_v13, %v1151_v0  ;;  %v1149_v25 = vmul.f32 11.313708, %v1040_v62  ;;  %v3181_v41 = vld [vmem:[%s5691_s3 + $0xe0] sm:$0xff]  }
 0x1c7   : > { %v3283_v8 = vpop.f32.mrf.mxu1  ;;  %v2383_v42 = vmul.f32 %v3657_v30, %v5338_v35  ;;  %v3144_v0 = vunpack.c.l.bf16 %v3182_v53  ;;  %v3140_v31 = vunpack.c.l.bf16 %v3181_v41 }
 0x1c8   : > { %2695 = vst [vmem:[%s5358_s7 + $0x190] sm:$0xff] %v2631_v51  ;;  %v2629_v3 = vadd.f32 %v3124_v17, %v2437_v39  ;;  %v2440_v9 = vadd.f32 %v2376_v57, %v1988_v54  ;;  %v1986_v52 = vadd.f32 %v6032_v59, %v1149_v25  ;;  %v1154_v22 = vmul.f32 11.313708, %v3283_v8  ;;  %v6037_v51 = vld [vmem:[#allocation8_spill] sm:$0xff] }
 0x1c9   : > { %v1053_v14 = vpop.f32.mrf.mxu1  ;;  %v3653_v54 = vunpack.i.h.bf16 %v3651_v7  ;;  %v2381_v25 = vmul.f32 %v3652_v36, %v5338_v35 }
 0x1ca   : > { %2693 = vst [vmem:[%s5358_s7 + $0x180] sm:$0xff] %v2629_v3  ;;  %v2632_v19 = vadd.f32 %v3129_v12, %v2440_v9  ;;  %v2438_v45 = vadd.f32 %v2374_v29, %v1986_v52  ;;  %v1991_v2 = vadd.f32 %v6033_v34, %v1154_v22  ;;  %v1152_v38 = vmul.f32 11.313708, %v1053_v14  ;;  %v6038_v3 = vld [vmem:[#allocation6_spill] sm:$0xff]  ;;  %v6039_v14 = vld [vmem:[#allocation7_spill] sm:$0xff] }
 0x1cb   : > { %v3284_v32 = vpop.f32.mrf.mxu1  ;;  %v2384_v52 = vmul.f32 %v3658_v21, %v5338_v35  ;;  %v3667_v22 = vunpack.i.l.bf16 %v3666_v1  ;;  %v2382_v34 = vmul.f32 %v3653_v54, %v5338_v35  ;;  %v6043_v21 = vld [vmem:[#allocation11_spill] sm:$0xff] }
 0x1cc   : > { %2696 = vst [vmem:[%s5358_s7 + $0x198] sm:$0xff] %v2632_v19  ;;  %v2630_v63 = vadd.f32 %v3125_v23, %v2438_v45  ;;  %v2443_v47 = vadd.f32 %v2379_v18, %v1991_v2  ;;  %v1989_v44 = vadd.f32 %v6034_v28, %v1152_v38  ;;  %v1155_v26 = vmul.f32 11.313708, %v3284_v32  ;;  %v3184_v45 = vld [vmem:[%s5691_s3 + $0xf8] sm:$0xff]   ;;  %v6040_v32 = vld [vmem:[#allocation5_spill] sm:$0xff] }
 0x1cd   : > { %v1056_v55 = vpop.f32.mrf.mxu1  ;;  %v3662_v2 = vunpack.i.l.bf16 %v3661_v56  ;;  %v3141_v38 = vunpack.c.h.bf16 %v3181_v41  ;;  %v3668_v28 = vunpack.i.h.bf16 %v3666_v1 }
 0x1ce   : > { %2694 = vst [vmem:[%s5358_s7 + $0x188] sm:$0xff] %v2630_v63  ;;  %v2635_v50 = vadd.f32 %v3136_v40, %v2443_v47  ;;  %v2441_v48 = vadd.f32 %v2377_v5, %v1989_v44  ;;  %v1992_v4 = vadd.f32 %v6035_v6, %v1155_v26  ;;  %v1153_v15 = vmul.f32 11.313708, %v1056_v55  ;;  %v3183_v47 = vld [vmem:[%s5691_s3 + $0xf0] sm:$0xff]   ;;  %v6041_v55 = vld [vmem:[#allocation12_spill] sm:$0xff] }
 0x1cf   : > { %v3287_v43 = vpop.f32.mrf.mxu1  ;;  %v2387_v44 = vmul.f32 %v3667_v22, %v5338_v35  ;;  %v3152_v26 = vunpack.c.l.bf16 %v3184_v45  ;;  %v3663_v6 = vunpack.i.h.bf16 %v3661_v56 }
 0x1d0   : > { %2699 = vst [vmem:[%s5358_s7 + $0x1b0] sm:$0xff] %v2635_v50  ;;  %v2633_v11 = vadd.f32 %v3132_v16, %v2441_v48  ;;  %v2444_v17 = vadd.f32 %v2380_v58, %v1992_v4  ;;  %v1990_v37 = vadd.f32 %v6036_v20, %v1153_v15  ;;  %v1158_v27 = vmul.f32 11.313708, %v3287_v43 }
 0x1d1   : > { %v1069_v57 = vpop.f32.mrf.mxu1  ;;  %v2385_v4 = vmul.f32 %v3662_v2, %v5338_v35  ;;  %v3148_v15 = vunpack.c.l.bf16 %v3183_v47  ;;  %v3153_v20 = vunpack.c.h.bf16 %v3184_v45  ;;  %v2386_v1 = vmul.f32 %v3663_v6, %v5338_v35 }
 0x1d2   : > { %2697 = vst [vmem:[%s5358_s7 + $0x1a0] sm:$0xff] %v2633_v11  ;;  %v2636_v12 = vadd.f32 %v3137_v33, %v2444_v17  ;;  %v2442_v62 = vadd.f32 %v2378_v24, %v1990_v37  ;;  %v1995_v39 = vadd.f32 %v6037_v51, %v1158_v27  ;;  %v1156_v13 = vmul.f32 11.313708, %v1069_v57  ;;  %v6044_v51 = vld [vmem:[#allocation10_spill] sm:$0xff] }
 0x1d3   : > { %v3288_v29 = vpop.f32.mrf.mxu1  ;;  %v2388_v17 = vmul.f32 %v3668_v28, %v5338_v35  ;;  %v3149_v57 = vunpack.c.h.bf16 %v3183_v47 }
 0x1d4   : > { %2700 = vst [vmem:[%s5358_s7 + $0x1b8] sm:$0xff] %v2636_v12  ;;  %v2634_v23 = vadd.f32 %v3133_v10, %v2442_v62  ;;  %v2447_v8 = vadd.f32 %v2383_v42, %v1995_v39  ;;  %v1993_v9 = vadd.f32 %v6038_v3, %v1156_v13  ;;  %v1159_v59 = vmul.f32 11.313708, %v3288_v29  ;;  %v6042_v10 = vld [vmem:[#allocation9_spill] sm:$0xff] }
 0x1d5   : > { %v1072_v61 = vpop.f32.mrf.mxu1 }
 0x1d6   : > { %2698 = vst [vmem:[%s5358_s7 + $0x1a8] sm:$0xff] %v2634_v23  ;;  %v2639_v18 = vadd.f32 %v3144_v0, %v2447_v8  ;;  %v2445_v40 = vadd.f32 %v2381_v25, %v1993_v9  ;;  %v1996_v49 = vadd.f32 %v6039_v14, %v1159_v59  ;;  %v1157_v19 = vmul.f32 11.313708, %v1072_v61 }
 0x1d7   : > { %v3291_v46 = vpop.f32.mrf.mxu1 }
 0x1d8   : > { %2703 = vst [vmem:[%s5358_s7 + $0x1d0] sm:$0xff] %v2639_v18  ;;  %v2637_v5 = vadd.f32 %v3140_v31, %v2445_v40  ;;  %v2448_v16 = vadd.f32 %v2384_v52, %v1996_v49  ;;  %v1994_v7 = vadd.f32 %v6040_v32, %v1157_v19  ;;  %v1162_v63 = vmul.f32 11.313708, %v3291_v46 }
 0x1d9   : > { %v1085_v58 = vpop.f32.mrf.mxu1 }
 0x1da   : > { %2701 = vst [vmem:[%s5358_s7 + $0x1c0] sm:$0xff] %v2637_v5  ;;  %v2640_v30 = vadd.f32 %v3145_v60, %v2448_v16  ;;  %v2446_v33 = vadd.f32 %v2382_v34, %v1994_v7  ;;  %v1999_v50 = vadd.f32 %v6041_v55, %v1162_v63  ;;  %v1160_v48 = vmul.f32 11.313708, %v1085_v58 }
 0x1db   : > { %v3292_v53 = vpop.f32.mrf.mxu1 }
 0x1dc   : > { %2704 = vst [vmem:[%s5358_s7 + $0x1d8] sm:$0xff] %v2640_v30  ;;  %v2638_v24 = vadd.f32 %v3141_v38, %v2446_v33  ;;  %v2451_v36 = vadd.f32 %v2387_v44, %v1999_v50  ;;  %v1997_v43 = vadd.f32 %v6042_v10, %v1160_v48  ;;  %v1163_v11 = vmul.f32 11.313708, %v3292_v53 }
 0x1dd   : > { %v1088_v37 = vpop.f32.mrf.mxu1 }
 0x1de   : > { %2702 = vst [vmem:[%s5358_s7 + $0x1c8] sm:$0xff] %v2638_v24  ;;  %v2643_v27 = vadd.f32 %v3152_v26, %v2451_v36  ;;  %v2449_v41 = vadd.f32 %v2385_v4, %v1997_v43  ;;  %v2000_v42 = vadd.f32 %v6043_v21, %v1163_v11  ;;  %v1161_v0 = vmul.f32 11.313708, %v1088_v37 }
 0x1e0   : > { %2707 = vst [vmem:[%s5358_s7 + $0x1f0] sm:$0xff] %v2643_v27  ;;  %v2641_v12 = vadd.f32 %v3148_v15, %v2449_v41  ;;  %v2452_v62 = vadd.f32 %v2388_v17, %v2000_v42  ;;  %v1998_v39 = vadd.f32 %v6044_v51, %v1161_v0 }
 0x1e2   : > { %2705 = vst [vmem:[%s5358_s7 + $0x1e0] sm:$0xff] %v2641_v12  ;;  %v2644_v13 = vadd.f32 %v3153_v20, %v2452_v62  ;;  %v2450_v54 = vadd.f32 %v2386_v1, %v1998_v39 }
 0x1e4   : > { %2708 = vst [vmem:[%s5358_s7 + $0x1f8] sm:$0xff] %v2644_v13  ;;  %v2642_v35 = vadd.f32 %v3149_v57, %v2450_v54 }
 0x1e6   : > { %2706 = vst [vmem:[%s5358_s7 + $0x1e8] sm:$0xff] %v2642_v35 }
 0x1e7   : > { %3686 = shalt.err (!%p3683_p3)
}
 0x1e8   : > { %s3687_s22 = scalar_lea.hbm %s5640_s10, 8192  ;;  %s3691_s23 = scalar_lea.hbm %s5692_s4, 32768 }
 0x1e9   : > { %p3688_p4 = scmp.ne.s32.totalorder %s5640_s10, %s3687_s22  ;;  %p3692_p9 = scmp.lt.s32.totalorder %s5640_s10, %s5692_s4 }
 0x1ea   : > { %p3693_p10 = scmp.lt.s32.totalorder %s3691_s23, %s3687_s22 }
 0x1eb   : > { %p3689_p7 = pnand %p3688_p4, %p3804_p5 }
 0x1ec   : > { %p3694_p11 = por %p3693_p10, %p3692_p9 }
 0x1ed   : > { %p3690_p8 = pneg %p3689_p7 }
 0x1ef   : > { %p3695_p12 = pnand %p3694_p11, %p3690_p8 }
 0x1f1   : > { %3698 = shalt.err (!%p3695_p12)
}
 0x1f2   : > { %s3739_s29 = smov 128   ;;  %s3740_s30 = smov 8  }
 0x1f3   : > { %3301 = dma.vmem_to_hbm [thread:$0]  (%p3804_p5), %s5642_s6, 8192, %s5640_s10, %s5648_s11, %s3739_s29, %s3739_s29, %s3740_s30  }
 0x1f4 PF: > { %p3307_p13 = scmp.ge.s32.totalorder %s3733_s18, 2  ;;  %s2738_s5 = sand.u32 1, %s3721_s15  }
 0x1f5   : > { %s2739_s8 = scalar_lea.sflag [#allocation3], %s2738_s5 }
 0x1f6   : > { %p3304_p0 = pnand %p3307_p13, %p3808_p6 }
 0x1f8   : > { %p3305_p1 = pneg %p3304_p0 }
 0x1fa   : > { %3716 = dma.done.wait (%p3305_p1), %s2739_s8, 8192  }
 0x1fb   : > { %3718 = vsyncadd (%p3305_p1), %s2739_s8, 4294959104  ;;  %p14_p2 = scmp.ge.s32.totalorder %s3791_s21, 6   ;;  %s6045_s15 = smov %s3725_s16 }
 0x1fc   : > { %s6046_s16 = smov %s3729_s17  ;;  %s6047_s17 = smov %s3802_s24 }
 0x1fd   : > { %s6048_s18 = smov %s3791_s21  ;;  %16 = sbr.rel (!%p14_p2) target bundleno = 3 (0x3), region = 71 }
 0x202   :  { %2744 = vsyncpa [#allocation3], 1 }
 0x203   :  { %2746 = vsyncpa [#allocation3 + $0x1], 1 }

</bundles_post_ra>
